<compile_context>
chip_gen: v7x
topology: tpu7x:2x2x1
jax: 0.10.0
libtpu: 0.0.40
codegen_flags: <defaults>
</compile_context>

<pallas_src>
import jax
import jax.numpy as jnp
from jax import lax
from jax.experimental import pallas as pl
from jax.experimental.pallas import tpu as pltpu


def _infer_fe1d_kernel(x_ref, w1_ref, b1_ref, w2_ref, b2_ref, o_ref):
    # x_ref : (C_in,    COLS)   columns = batches-per-step * L_pad (lane axis)
    # w1_ref: (C_hid_p, 3*C_in) conv1 weights, taps flattened into K
    # b1_ref: (C_hid_p, 1)      f32
    # w2_ref: (C_out,   C_hid_p)
    # b2_ref: (C_out,   1)      f32
    # o_ref : (C_out,   COLS)
    x = x_ref[...]
    cols = x.shape[-1]

    # 'same' zero padding, kernel_size=3: neighbour columns via XLU roll.
    # No edge masks needed: every L_pad-wide batch segment ends in >=1 zero
    # column (guaranteed by the wrapper), so all wrap-around sources are zero
    # and garbage only lands in padded columns that are sliced off outside.
    x_prev = pltpu.roll(x, shift=1, axis=1)          # x[:, l-1]
    x_next = pltpu.roll(x, shift=cols - 1, axis=1)   # x[:, l+1]

    # Single fused MXU matmul over the stacked taps (K = 3*C_in) instead of
    # three matmuls + two full-size VALU accumulations.
    xs = jnp.concatenate([x_prev, x, x_next], axis=0).astype(w1_ref.dtype)
    h = jnp.dot(w1_ref[...], xs, preferred_element_type=jnp.float32)
    h = jnp.maximum(h + b1_ref[...], 0.0)            # bias + ReLU in f32

    # Conv1d(k=1) == channel matmul; MXU operands in compute dtype.
    y = jnp.dot(w2_ref[...], h.astype(w2_ref.dtype),
                preferred_element_type=jnp.float32) + b2_ref[...]
    o_ref[...] = jnp.maximum(y, 0.0).astype(o_ref.dtype)


def infer_feature_extractor_1d(x, params, *, compute_dtype=jnp.float32,
                               max_cols_per_step=8192):
    """Pallas equivalent of INFERFeatureExtractor1D.forward."""
    w1 = params["w1"]          # (C_hid, C_in, 3)   -- torch Conv1d layout
    b1 = params["b1"]          # (C_hid,)
    w2 = params["w2"]          # (C_out, C_hid, 1)
    b2 = params["b2"]          # (C_out,)

    B, C_in, H, W = x.shape
    C_hid = w1.shape[0]
    C_out = w2.shape[0]
    L = H * W

    # Lane-dense layout with >= 1 guaranteed zero right-pad column per batch
    # segment (this is what lets the kernel drop all edge masks).
    L_pad = ((L + 1 + 127) // 128) * 128
    # Pad hidden channels to a multiple of 128 (300 -> 384): removes the
    # ragged 44-row tail in conv1's M and conv2's K.
    C_hid_p = ((C_hid + 127) // 128) * 128

    # Input plumbing: pad L, fold batch into the lane axis -> (C_in, B*L_pad).
    xf = x.reshape(B, C_in, L)
    xf = jnp.pad(xf, ((0, 0), (0, 0), (0, L_pad - L)))
    xf = jnp.transpose(xf, (1, 0, 2)).reshape(C_in, B * L_pad)
    xf = xf.astype(compute_dtype)

    # Weight plumbing (layout only, no compute hoisting).
    w1_flat = jnp.transpose(w1, (0, 2, 1)).reshape(C_hid, 3 * C_in)   # taps->K
    w1_flat = jnp.pad(w1_flat, ((0, C_hid_p - C_hid), (0, 0))).astype(compute_dtype)
    b1_col = jnp.pad(b1, (0, C_hid_p - C_hid)).reshape(C_hid_p, 1).astype(jnp.float32)
    w2_mat = jnp.pad(w2[:, :, 0], ((0, 0), (0, C_hid_p - C_hid))).astype(compute_dtype)
    b2_col = b2.reshape(C_out, 1).astype(jnp.float32)

    # Batches per grid step: largest divisor of B whose fused column count
    # stays within a VMEM-friendly cap (f32 hidden = C_hid_p*4 B/column).
    bps = 1
    for d in range(1, B + 1):
        if B % d == 0 and d * L_pad <= max_cols_per_step:
            bps = d
    cols = bps * L_pad
    steps = B // bps

    itemsize = jnp.dtype(compute_dtype).itemsize
    flops = 2 * B * L * (3 * C_in * C_hid + C_hid * C_out)
    bytes_accessed = (xf.size * itemsize
                      + C_out * B * L_pad * jnp.dtype(x.dtype).itemsize
                      + (w1_flat.size + w2_mat.size) * itemsize
                      + (C_hid_p + C_out) * 4)

    out = pl.pallas_call(
        _infer_fe1d_kernel,
        out_shape=jax.ShapeDtypeStruct((C_out, B * L_pad), x.dtype),
        grid=(steps,),
        in_specs=[
            pl.BlockSpec((C_in, cols), lambda i: (0, i)),
            pl.BlockSpec((C_hid_p, 3 * C_in), lambda i: (0, 0)),   # resident
            pl.BlockSpec((C_hid_p, 1), lambda i: (0, 0)),          # resident
            pl.BlockSpec((C_out, C_hid_p), lambda i: (0, 0)),      # resident
            pl.BlockSpec((C_out, 1), lambda i: (0, 0)),            # resident
        ],
        out_specs=pl.BlockSpec((C_out, cols), lambda i: (0, i)),
        compiler_params=pltpu.CompilerParams(
            dimension_semantics=("parallel",)),                    # megacore
        cost_estimate=pl.CostEstimate(
            flops=flops, transcendentals=0, bytes_accessed=bytes_accessed),
    )(xf, w1_flat, b1_col, w2_mat, b2_col)

    # Unfold: (C_out, B*L_pad) -> (B, C_out, L) -> (B, C_out, H, W).
    out = out.reshape(C_out, B, L_pad).transpose(1, 0, 2)[:, :, :L]
    return out.reshape(B, C_out, H, W)


def init_params(key, input_channels, hidden=300, output_channels=3):
    """Deterministic init mirroring the torch module's layer shapes."""
    k1, k2, k3, k4 = jax.random.split(key, 4)
    w1 = jax.random.normal(k1, (hidden, input_channels, 3), jnp.float32) * 0.1
    b1 = jax.random.normal(k2, (hidden,), jnp.float32) * 0.1
    w2 = jax.random.normal(k3, (output_channels, hidden, 1), jnp.float32) * 0.1
    b2 = jax.random.normal(k4, (output_channels,), jnp.float32) * 0.1
    return {"w1": w1, "b1": b1, "w2": w2, "b2": b2}


def reference_forward(x, params):
    """Pure-JAX (XLA) reference of the same forward pass, for verification."""
    w1, b1, w2, b2 = params["w1"], params["b1"], params["w2"], params["b2"]
    B, C, H, W = x.shape
    L = H * W
    prec = lax.Precision.HIGHEST
    xf = x.reshape(B, C, L)
    xp = jnp.pad(xf, ((0, 0), (0, 0), (1, 1)))     # 'same' zero padding, k=3
    h = (jnp.einsum("oc,bcl->bol", w1[:, :, 0], xp[:, :, 0:L], precision=prec)
         + jnp.einsum("oc,bcl->bol", w1[:, :, 1], xp[:, :, 1:L + 1], precision=prec)
         + jnp.einsum("oc,bcl->bol", w1[:, :, 2], xp[:, :, 2:L + 2], precision=prec)
         + b1[None, :, None])
    h = jnp.maximum(h, 0.0)
    y = jnp.einsum("oc,bcl->bol", w2[:, :, 0], h, precision=prec) + b2[None, :, None]
    y = jnp.maximum(y, 0.0)
    return y.reshape(B, -1, H, W)


if __name__ == "__main__":
    key = jax.random.PRNGKey(0)
    k_params, k_x = jax.random.split(key)

    B, C_in, H, W = 2, 4, 16, 16                  # L = 256 -> L_pad = 384
    params = init_params(k_params, C_in)
    x = jax.random.normal(k_x, (B, C_in, H, W), dtype=jnp.float32)

    y_ref = reference_forward(x, params)

    # f32 MXU operands (safe default, v5e-friendly).
    y32 = jax.block_until_ready(infer_feature_extractor_1d(x, params))
    assert y32.shape == (B, 3, H, W) and y32.dtype == x.dtype
    assert bool(jnp.allclose(y32, y_ref, atol=1e-2, rtol=1e-2)), (
        "f32 mismatch vs reference: max abs err = "
        + str(float(jnp.max(jnp.abs(y32 - y_ref)))))

    # bf16 MXU operands (v6e / v7x fast path); accumulation + bias/ReLU in f32.
    ybf = jax.block_until_ready(
        infer_feature_extractor_1d(x, params, compute_dtype=jnp.bfloat16))
    assert ybf.shape == (B, 3, H, W) and ybf.dtype == x.dtype
    assert bool(jnp.allclose(ybf, y_ref, atol=5e-2, rtol=5e-2)), (
        "bf16 mismatch vs reference: max abs err = "
        + str(float(jnp.max(jnp.abs(ybf - y_ref)))))

    print("KERNEL_OK")
</pallas_src>

<mosaic_0001>
module attributes {stable_mosaic.version = 11 : i64} {
  func.func @_infer_fe1d_kernel(%arg0: i32, %arg1: memref<4x768xf32, #tpu.memory_space<vmem>>, %arg2: memref<384x12xf32, #tpu.memory_space<vmem>>, %arg3: memref<384x1xf32, #tpu.memory_space<vmem>>, %arg4: memref<3x384xf32, #tpu.memory_space<vmem>>, %arg5: memref<3x1xf32, #tpu.memory_space<vmem>>, %arg6: memref<3x768xf32, #tpu.memory_space<vmem>>) attributes {dimension_semantics = [#tpu.dimension_semantics<parallel>], iteration_bounds = array<i64: 1>, scalar_prefetch = 0 : i64, scratch_operands = 0 : i64, tpu.core_type = #tpu.core_type<tc>, window_params = [{transform_indices = @transform_0, window_bounds = array<i64: 4, 768>}, {pipeline_mode = #tpu.pipeline_mode<synchronous>, transform_indices = @transform_1, window_bounds = array<i64: 384, 12>}, {pipeline_mode = #tpu.pipeline_mode<synchronous>, transform_indices = @transform_2, window_bounds = array<i64: 384, 1>}, {pipeline_mode = #tpu.pipeline_mode<synchronous>, transform_indices = @transform_3, window_bounds = array<i64: 3, 384>}, {pipeline_mode = #tpu.pipeline_mode<synchronous>, transform_indices = @transform_4, window_bounds = array<i64: 3, 1>}, {transform_indices = @transform_5, window_bounds = array<i64: 3, 768>}]} {
    %c0 = arith.constant 0 : index
    %c0_0 = arith.constant 0 : index
    %0 = vector.load %arg1[%c0, %c0_0] : memref<4x768xf32, #tpu.memory_space<vmem>>, vector<4x768xf32>
    %c1_i32 = arith.constant 1 : i32
    %1 = tpu.dynamic_rotate %0 by %c1_i32 dim 1 : vector<4x768xf32>, i32 -> vector<4x768xf32>
    %c767_i32 = arith.constant 767 : i32
    %2 = tpu.dynamic_rotate %0 by %c767_i32 dim 1 : vector<4x768xf32>, i32 -> vector<4x768xf32>
    %3 = tpu.concatenate %1, %0, %2 in 0 : vector<4x768xf32>, vector<4x768xf32>, vector<4x768xf32> -> vector<12x768xf32>
    %c0_1 = arith.constant 0 : index
    %c0_2 = arith.constant 0 : index
    %4 = vector.load %arg2[%c0_1, %c0_2] : memref<384x12xf32, #tpu.memory_space<vmem>>, vector<384x12xf32>
    %cst = arith.constant dense<0.000000e+00> : vector<384x768xf32>
    %5 = tpu.matmul %4, %3, %cst {dimension_numbers = #tpu.dot_dimension_numbers<[1], [0], [0], [1], [0, 0, 1, 1], [], []>} : vector<384x12xf32>, vector<12x768xf32>, vector<384x768xf32> -> vector<384x768xf32>
    %c0_3 = arith.constant 0 : index
    %c0_4 = arith.constant 0 : index
    %6 = vector.load %arg3[%c0_3, %c0_4] : memref<384x1xf32, #tpu.memory_space<vmem>>, vector<384x1xf32>
    %7 = vector.broadcast %6 : vector<384x1xf32> to vector<384x768xf32>
    %8 = arith.addf %5, %7 : vector<384x768xf32>
    %cst_5 = arith.constant 0.000000e+00 : f32
    %9 = vector.broadcast %cst_5 : f32 to vector<384x768xf32>
    %10 = arith.maximumf %8, %9 : vector<384x768xf32>
    %c0_6 = arith.constant 0 : index
    %c0_7 = arith.constant 0 : index
    %11 = vector.load %arg4[%c0_6, %c0_7] : memref<3x384xf32, #tpu.memory_space<vmem>>, vector<3x384xf32>
    %cst_8 = arith.constant dense<0.000000e+00> : vector<3x768xf32>
    %12 = tpu.matmul %11, %10, %cst_8 {dimension_numbers = #tpu.dot_dimension_numbers<[1], [0], [0], [1], [0, 0, 1, 1], [], []>} : vector<3x384xf32>, vector<384x768xf32>, vector<3x768xf32> -> vector<3x768xf32>
    %c0_9 = arith.constant 0 : index
    %c0_10 = arith.constant 0 : index
    %13 = vector.load %arg5[%c0_9, %c0_10] : memref<3x1xf32, #tpu.memory_space<vmem>>, vector<3x1xf32>
    %14 = vector.broadcast %13 : vector<3x1xf32> to vector<3x768xf32>
    %15 = arith.addf %12, %14 : vector<3x768xf32>
    %cst_11 = arith.constant 0.000000e+00 : f32
    %16 = vector.broadcast %cst_11 : f32 to vector<3x768xf32>
    %17 = arith.maximumf %15, %16 : vector<3x768xf32>
    %c0_12 = arith.constant 0 : index
    %c0_13 = arith.constant 0 : index
    %18 = vector.load %arg6[%c0_12, %c0_13] : memref<3x768xf32, #tpu.memory_space<vmem>>, vector<3x768xf32>
    tpu.vector_store %arg6[%c0_12, %c0_13], %17 {strides = array<i32>} : memref<3x768xf32, #tpu.memory_space<vmem>>, vector<3x768xf32>,
    return
  }
  func.func @transform_0(%arg0: i32) -> (i32, i32) {
    %c0_i32 = arith.constant 0 : i32
    %c0_i32_0 = arith.constant 0 : i32
    return %c0_i32, %arg0 : i32, i32
  }
  func.func @transform_1(%arg0: i32) -> (i32, i32) {
    %c0_i32 = arith.constant 0 : i32
    %c0_i32_0 = arith.constant 0 : i32
    %c0_i32_1 = arith.constant 0 : i32
    return %c0_i32, %c0_i32_0 : i32, i32
  }
  func.func @transform_2(%arg0: i32) -> (i32, i32) {
    %c0_i32 = arith.constant 0 : i32
    %c0_i32_0 = arith.constant 0 : i32
    %c0_i32_1 = arith.constant 0 : i32
    return %c0_i32, %c0_i32_0 : i32, i32
  }
  func.func @transform_3(%arg0: i32) -> (i32, i32) {
    %c0_i32 = arith.constant 0 : i32
    %c0_i32_0 = arith.constant 0 : i32
    %c0_i32_1 = arith.constant 0 : i32
    return %c0_i32, %c0_i32_0 : i32, i32
  }
  func.func @transform_4(%arg0: i32) -> (i32, i32) {
    %c0_i32 = arith.constant 0 : i32
    %c0_i32_0 = arith.constant 0 : i32
    %c0_i32_1 = arith.constant 0 : i32
    return %c0_i32, %c0_i32_0 : i32, i32
  }
  func.func @transform_5(%arg0: i32) -> (i32, i32) {
    %c0_i32 = arith.constant 0 : i32
    %c0_i32_0 = arith.constant 0 : i32
    return %c0_i32, %arg0 : i32, i32
  }
}

</mosaic_0001>

<bundles_post_ra>
// kernel: tpu_custom_call.1
= control target key start
LH: loop header
LB: loop body
LE: loop exit
PB: predicated region body
PF: predicated region fallthrough
CT: control target
= control target key end

     0   :  { %s4528_s0 = inlined_call_operand.vmem [shape: f32[4,768], index: 0, kind: input, shape index: {}]   ;;  %s4529_s1 = inlined_call_operand.vmem [shape: f32[384,12], index: 1, kind: input, shape index: {}]   ;;  %s4530_s2 = inlined_call_operand.vmem [shape: f32[384,1], index: 2, kind: input, shape index: {}]   ;;  %s4531_s3 = inlined_call_operand.vmem [shape: f32[3,384], index: 3, kind: input, shape index: {}]   ;;  %s4532_s4 = inlined_call_operand.vmem [shape: f32[3,1], index: 4, kind: input, shape index: {}]   ;;  %s4533_s5 = inlined_call_operand.hbm [shape: f32[3,768], index: 5, kind: output, shape index: {}]  }
   0x1   :  { %v2985_v0 = vld [vmem:[%s4528_s0] sm:$0xff]  ;;  %v2990_v1 = vld [vmem:[%s4528_s0 + $0x8] sm:$0xff] }
   0x2   :  { %v27_v2 = vcombine.high %v2985_v0, %v2985_v0 }
   0x3   :  { %10 = vsyncpa [#allocation3], 0  ;;  %v2997_v3 = vld [vmem:[%s4528_s0 + $0x10] sm:$0xff]  ;;  %v4545_v6 = vmov 0.0   ;;  %s2947_s24 = smov 127   ;;  %s2948_s25 = smov 1   ;;  %v28_v8 = vcombine.high %v2990_v1, %v2990_v1  ;;  %v45_v45 = vlaneseq  ;;  %v73_v59 = vcombine.low %v2985_v0, %v2985_v0 }
   0x4   :  { %v2885_v4 = vpack.i.bf16 %v2990_v1, %v27_v2  ;;  %v2880_v5 = vpack.i.bf16 %v27_v2, %v2985_v0  ;;  %649 = vmatprep.mubr.f32.mxu0 %v4545_v6  ;;  %865 = vmatprep.mubr.f32.mxu1 %v4545_v6  ;;  %v29_v7 = vcombine.high %v2997_v3, %v2997_v3  ;;  %v2949_v11 = vmov 0   ;;  %v135_v12 = vld [vmem:[%s4530_s2 + $0x8] sm:$0xff]  ;;  %v136_v13 = vld [vmem:[%s4530_s2 + $0x10] sm:$0xff]  ;;  %v134_v14 = vld [vmem:[%s4530_s2] sm:$0xff] }
   0x5   :  { %v2890_v9 = vpack.i.bf16 %v28_v8, %v2990_v1  ;;  %v2895_v10 = vpack.i.bf16 %v2997_v3, %v28_v8  ;;  %2901 = vset.pattern.permute.xlu1 %v2949_v11  ;;  %2900 = vset.pattern.permute.xlu0 %v2949_v11  ;;  %v138_v15 = vld [vmem:[%s4530_s2 + $0x20] sm:$0xff]  ;;  %v137_v16 = vld [vmem:[%s4530_s2 + $0x18] sm:$0xff]  ;;  %v140_v17 = vld [vmem:[%s4530_s2 + $0x30] sm:$0xff]  ;;  %v3116_v48 = vand.u32 127, %v45_v45  ;;  %vm79_vm2 = vcmask 1043456  }
   0x6   :  { %2886 = vrot.lane.b32.xlu1 %v2885_v4, %s2947_s24  ;;  %2881 = vrot.lane.b32.xlu0 %v2880_v5, %s2948_s25  ;;  %v139_v18 = vld [vmem:[%s4530_s2 + $0x28] sm:$0xff]  ;;  %v142_v19 = vld [vmem:[%s4530_s2 + $0x40] sm:$0xff]  ;;  %vm2950_vm3 = vmmov 1   ;;  %vm422_vm5 = vcmask 97280  }
   0x7   :  { %v141_v20 = vld [vmem:[%s4530_s2 + $0x38] sm:$0xff]  ;;  %v144_v21 = vld [vmem:[%s4530_s2 + $0x50] sm:$0xff]  ;;  %v143_v22 = vld [vmem:[%s4530_s2 + $0x48] sm:$0xff]  ;;  %vm66_vm0 = vcmp.lt.s32.totalorder %v3116_v48, 127  ;;  %vm47_vm1 = vcmp.lt.s32.totalorder %v3116_v48, 1 }
   0x8   :  { %v146_v23 = vld [vmem:[%s4530_s2 + $0x60] sm:$0xff]  ;;  %v145_v24 = vld [vmem:[%s4530_s2 + $0x58] sm:$0xff]  ;;  %v148_v25 = vld [vmem:[%s4530_s2 + $0x70] sm:$0xff] }
   0x9   :  { %v147_v26 = vld [vmem:[%s4530_s2 + $0x68] sm:$0xff]  ;;  %v150_v27 = vld [vmem:[%s4530_s2 + $0x80] sm:$0xff]  ;;  %v149_v28 = vld [vmem:[%s4530_s2 + $0x78] sm:$0xff] }
   0xa   :  { %54 = vrot.lane.b32.xlu1 %v2985_v0, %s2947_s24  ;;  %43 = vrot.lane.b32.xlu0 %v29_v7, %s2948_s25  ;;  %v152_v29 = vld [vmem:[%s4530_s2 + $0x90] sm:$0xff]  ;;  %v151_v30 = vld [vmem:[%s4530_s2 + $0x88] sm:$0xff]  ;;  %vm3147_vm4 = vmpackc.low %vm79_vm2, %vm2950_vm3 }
   0xb   :  { %v154_v31 = vld [vmem:[%s4530_s2 + $0xa0] sm:$0xff]  ;;  %v153_v32 = vld [vmem:[%s4530_s2 + $0x98] sm:$0xff]  ;;  %v156_v33 = vld [vmem:[%s4530_s2 + $0xb0] sm:$0xff] }
   0xc   :  { %v155_v34 = vld [vmem:[%s4530_s2 + $0xa8] sm:$0xff]  ;;  %v158_v35 = vld [vmem:[%s4530_s2 + $0xc0] sm:$0xff]  ;;  %v157_v36 = vld [vmem:[%s4530_s2 + $0xb8] sm:$0xff] }
   0xd   :  { %v160_v37 = vld [vmem:[%s4530_s2 + $0xd0] sm:$0xff]  ;;  %v159_v38 = vld [vmem:[%s4530_s2 + $0xc8] sm:$0xff]  ;;  %v162_v39 = vld [vmem:[%s4530_s2 + $0xe0] sm:$0xff] }
   0xe   :  { %41 = vrot.lane.b32.xlu1 %v2997_v3, %s2948_s25  ;;  %2891 = vrot.lane.b32.xlu0 %v2890_v9, %s2948_s25  ;;  %v161_v40 = vld [vmem:[%s4530_s2 + $0xd8] sm:$0xff]  ;;  %v164_v41 = vld [vmem:[%s4530_s2 + $0xf0] sm:$0xff] }
   0xf   :  { %v163_v42 = vld [vmem:[%s4530_s2 + $0xe8] sm:$0xff]  ;;  %v166_v43 = vld [vmem:[%s4530_s2 + $0x100] sm:$0xff]  ;;  %v165_v44 = vld [vmem:[%s4530_s2 + $0xf8] sm:$0xff] }
  0x10   :  { %v168_v46 = vld [vmem:[%s4530_s2 + $0x110] sm:$0xff]  ;;  %v167_v47 = vld [vmem:[%s4530_s2 + $0x108] sm:$0xff]  ;;  %v170_v49 = vld [vmem:[%s4530_s2 + $0x120] sm:$0xff] }
  0x11   :  { %v169_v50 = vld [vmem:[%s4530_s2 + $0x118] sm:$0xff]  ;;  %v172_v53 = vld [vmem:[%s4530_s2 + $0x130] sm:$0xff]  ;;  %v171_v54 = vld [vmem:[%s4530_s2 + $0x128] sm:$0xff] }
  0x12   :  { %64 = vrot.lane.b32.xlu1 %v29_v7, %s2947_s24  ;;  %2896 = vrot.lane.b32.xlu0 %v2895_v10, %s2947_s24  ;;  %v174_v5 = vld [vmem:[%s4530_s2 + $0x140] sm:$0xff]  ;;  %v173_v7 = vld [vmem:[%s4530_s2 + $0x138] sm:$0xff] }
  0x13   :  { %v3251_v45 = vld [vmem:[%s4529_s1 + $0x130] sm:$0xff]  ;;  %v3275_v48 = vld [vmem:[%s4529_s1 + $0x18] sm:$0xff] }
  0x14   :  { %v3398_v4 = vld [vmem:[%s4529_s1 + $0x170] sm:$0xff] }
  0x16   :  { %189 = vperm.xlu1 %2901, %v135_v12   ;;  %184 = vperm.xlu0 %2900, %v134_v14   ;;  %v176_v14 = vld [vmem:[%s4530_s2 + $0x150] sm:$0xff] }
  0x1a   :  { %194 = vperm.xlu1 %2901, %v136_v13   ;;  %199 = vperm.xlu0 %2900, %v137_v16  }
  0x1e   :  { %204 = vperm.xlu1 %2901, %v138_v15   ;;  %209 = vperm.xlu0 %2900, %v139_v18   ;;  %v175_v15 = vld [vmem:[%s4530_s2 + $0x148] sm:$0xff] }
  0x22   :  { %214 = vperm.xlu1 %2901, %v140_v17   ;;  %219 = vperm.xlu0 %2900, %v141_v20   ;;  %v3183_v20 = vld [vmem:[%s4529_s1] sm:$0xff] }
  0x26   :  { %224 = vperm.xlu1 %2901, %v142_v19   ;;  %229 = vperm.xlu0 %2900, %v143_v22   ;;  %v75_v19 = vcombine.low %v2997_v3, %v2997_v3 }
  0x2a   :  { %234 = vperm.xlu1 %2901, %v144_v21   ;;  %239 = vperm.xlu0 %2900, %v145_v24   ;;  %v3188_v21 = vld [vmem:[%s4529_s1 + $0x120] sm:$0xff]  ;;  %v74_v24 = vcombine.low %v2990_v1, %v2990_v1 }
  0x2e   :  { %244 = vperm.xlu1 %2901, %v146_v23   ;;  %249 = vperm.xlu0 %2900, %v147_v26  }
  0x32   :  { %254 = vperm.xlu1 %2901, %v148_v25   ;;  %259 = vperm.xlu0 %2900, %v149_v28  }
  0x36   :  { %264 = vperm.xlu1 %2901, %v150_v27   ;;  %269 = vperm.xlu0 %2900, %v151_v30   ;;  %v178_v30 = vld [vmem:[%s4530_s2 + $0x160] sm:$0xff] }
  0x3a   :  { %274 = vperm.xlu1 %2901, %v152_v29   ;;  %279 = vperm.xlu0 %2900, %v153_v32  }
  0x3e   :  { %284 = vperm.xlu1 %2901, %v154_v31   ;;  %289 = vperm.xlu0 %2900, %v155_v34   ;;  %v177_v31 = vld [vmem:[%s4530_s2 + $0x158] sm:$0xff]  ;;  %v3220_v34 = vld [vmem:[%s4529_s1 + $0x8] sm:$0xff] }
  0x42   :  { %294 = vperm.xlu1 %2901, %v156_v33   ;;  %299 = vperm.xlu0 %2900, %v157_v36  }
  0x46   :  { %304 = vperm.xlu1 %2901, %v158_v35   ;;  %309 = vperm.xlu0 %2900, %v159_v38   ;;  %v3225_v35 = vld [vmem:[%s4529_s1 + $0x128] sm:$0xff] }
  0x4a   :  { %314 = vperm.xlu1 %2901, %v160_v37   ;;  %319 = vperm.xlu0 %2900, %v161_v40  }
  0x4e   :  { %324 = vperm.xlu1 %2901, %v162_v39   ;;  %329 = vperm.xlu0 %2900, %v163_v42  }
  0x52   :  { %334 = vperm.xlu1 %2901, %v164_v41   ;;  %339 = vperm.xlu0 %2900, %v165_v44   ;;  %v3246_v44 = vld [vmem:[%s4529_s1 + $0x10] sm:$0xff] }
  0x56   :  { %344 = vperm.xlu1 %2901, %v166_v43   ;;  %349 = vperm.xlu0 %2900, %v167_v47   ;;  %v179_v47 = vld [vmem:[%s4530_s2 + $0x168] sm:$0xff] }
  0x5a   :  { %354 = vperm.xlu1 %2901, %v168_v46   ;;  %359 = vperm.xlu0 %2900, %v169_v50   ;;  %v180_v46 = vld [vmem:[%s4530_s2 + $0x170] sm:$0xff]  ;;  %v1934_v50 = vld [vmem:[%s4532_s4] sm:$0x7] }
  0x5e   :  { %364 = vperm.xlu1 %2901, %v170_v49   ;;  %369 = vperm.xlu0 %2900, %v171_v54   ;;  %v3280_v49 = vld [vmem:[%s4529_s1 + $0x138] sm:$0xff]  ;;  %v3313_v54 = vld [vmem:[%s4529_s1 + $0x28] sm:$0xff] }
  0x62   :  { %374 = vperm.xlu1 %2901, %v172_v53   ;;  %379 = vperm.xlu0 %2900, %v173_v7   ;;  %v3302_v53 = vld [vmem:[%s4529_s1 + $0x140] sm:$0xff]  ;;  %v3414_v7 = vld [vmem:[%s4529_s1 + $0x178] sm:$0xff] }
  0x66   :  { %384 = vperm.xlu1 %2901, %v174_v5   ;;  %389 = vperm.xlu0 %2900, %v175_v15   ;;  %v3409_v5 = vld [vmem:[%s4529_s1 + $0x58] sm:$0xff]  ;;  %v3513_v15 = vld [vmem:[%s4529_s1 + $0xa0] sm:$0xff] }
  0x6a   :  { %394 = vperm.xlu1 %2901, %v176_v14   ;;  %399 = vperm.xlu0 %2900, %v177_v31   ;;  %v3502_v14 = vld [vmem:[%s4529_s1 + $0x98] sm:$0xff] }
  0x6e   :  { %404 = vperm.xlu1 %2901, %v178_v30   ;;  %409 = vperm.xlu0 %2900, %v179_v47  }
  0x72   :  { %414 = vperm.xlu1 %2901, %v180_v46   ;;  %v3702_v46 = vld [vmem:[%s4529_s1 + $0x118] sm:$0xff] }
  0x76   :  { %1937 = vperm.xlu1 %2901, %v1934_v50  }
  0x78   :  { %v3124_v51 = vpop.permute.xlu1 %2886  ;;  %v2882_v52 = vpop.permute.xlu0 %2881 }
  0x79   :  { %v2889_v55 = vunpack.i.h.bf16 %v3124_v51  ;;  %v2888_v56 = vunpack.i.l.bf16 %v3124_v51  ;;  %v2884_v57 = vunpack.i.h.bf16 %v2882_v52  ;;  %v2883_v58 = vunpack.i.l.bf16 %v2882_v52  ;;  %v181_v51 = vld [vmem:[%s4530_s2 + $0x178] sm:$0xff]  ;;  %v3297_v52 = vld [vmem:[%s4529_s1 + $0x20] sm:$0xff] }
  0x7a   :  { %419 = vperm.xlu0 %2900, %v181_v51  }
  0x7b   :  { %v52_v60 = vsel %vm47_vm1, %v2883_v58, %v2884_v57  ;;  %v70_v61 = vsel %vm66_vm0, %v2888_v56, %v2889_v55 }
  0x7c   :  { %v55_v62 = vpop.permute.xlu1 %54  ;;  %v44_v63 = vpop.permute.xlu0 %43  ;;  %v81_v2 = vsel %vm79_vm2, %v52_v60, %v2985_v0  ;;  %v3361_v60 = vld [vmem:[%s4529_s1 + $0x40] sm:$0xff] }
  0x7d   :  { %v71_v8 = vsel %vm66_vm0, %v55_v62, %v2888_v56  ;;  %v53_v0 = vsel %vm47_vm1, %v44_v63, %v2883_v58  ;;  %v2554_v9 = vpack.c.bf16 %v70_v61, %v81_v2  ;;  %v3329_v56 = vld [vmem:[%s4529_s1 + $0x30] sm:$0xff]  ;;  %v3345_v58 = vld [vmem:[%s4529_s1 + $0x38] sm:$0xff]  ;;  %v3366_v61 = vld [vmem:[%s4529_s1 + $0x160] sm:$0xff] }
  0x7e   :  { %v80_v10 = vsel %vm79_vm2, %v53_v0, %v73_v59  ;;  %v3350_v59 = vld [vmem:[%s4529_s1 + $0x158] sm:$0xff]  ;;  %v3393_v2 = vld [vmem:[%s4529_s1 + $0x50] sm:$0xff]  ;;  %v3436_v0 = vld [vmem:[%s4529_s1 + $0x68] sm:$0xff] }
  0x7f   :  { %2556 = vmatprep.subr.msk.bf16.mxu0 %vm3147_vm4, %v2554_v9  ;;  %2860 = vmatprep.subr.msk.bf16.mxu1 %vm3147_vm4, %v2554_v9  ;;  %v2557_v11 = vpack.c.bf16 %v71_v8, %v80_v10  ;;  %v3425_v8 = vld [vmem:[%s4529_s1 + $0x60] sm:$0xff]  ;;  %v3447_v9 = vld [vmem:[%s4529_s1 + $0x70] sm:$0xff]  ;;  %v3458_v10 = vld [vmem:[%s4529_s1 + $0x78] sm:$0xff] }
  0x80   :  { %v42_v12 = vpop.permute.xlu1 %41  ;;  %v2892_v13 = vpop.permute.xlu0 %2891 }
  0x81   :  { %v48_v16 = vsel %vm47_vm1, %v42_v12, %v44_v63  ;;  %v2894_v17 = vunpack.i.h.bf16 %v2892_v13  ;;  %v2893_v18 = vunpack.i.l.bf16 %v2892_v13  ;;  %2559 = vmatpush1.bf16.msk.msra.mxu0 %vm3147_vm4, %v2557_v11  ;;  %2861 = vmatpush1.bf16.msk.msra.mxu1 %vm3147_vm4, %v2557_v11  ;;  %v3382_v63 = vld [vmem:[%s4529_s1 + $0x168] sm:$0xff]  ;;  %v3469_v11 = vld [vmem:[%s4529_s1 + $0x80] sm:$0xff]  ;;  %v3491_v13 = vld [vmem:[%s4529_s1 + $0x90] sm:$0xff] }
  0x82   :  { %v85_v27 = vsel %vm79_vm2, %v48_v16, %v2997_v3  ;;  %v3524_v16 = vld [vmem:[%s4529_s1 + $0xa8] sm:$0xff] }
  0x83   :  { %v49_v22 = vsel %vm47_vm1, %v2894_v17, %v42_v12  ;;  %v50_v23 = vsel %vm47_vm1, %v2893_v18, %v2894_v17  ;;  %v51_v25 = vsel %vm47_vm1, %v2884_v57, %v2893_v18  ;;  %v3334_v57 = vld [vmem:[%s4529_s1 + $0x150] sm:$0xff]  ;;  %v3480_v12 = vld [vmem:[%s4529_s1 + $0x88] sm:$0xff]  ;;  %v3546_v18 = vld [vmem:[%s4529_s1 + $0xb8] sm:$0xff] }
  0x84   :  { %v65_v26 = vpop.permute.xlu1 %64  ;;  %v2897_v28 = vpop.permute.xlu0 %2896  ;;  %v83_v29 = vsel %vm79_vm2, %v50_v23, %v2990_v1  ;;  %2406 = vmatmul.mubr.msk.f32.vlgmr.msra.gmra.mrb[0].mxu0 %vm422_vm5, %v3183_v20  ;;  %2442 = vmatmul.mubr.msk.f32.vlgmr.msra.gmra.mrb[0].mxu1 %vm422_vm5, %v3188_v21  ;;  %v84_v1 = vsel %vm79_vm2, %v49_v22, %v75_v19  ;;  %v82_v40 = vsel %vm79_vm2, %v51_v25, %v74_v24  ;;  %v3535_v17 = vld [vmem:[%s4529_s1 + $0xb0] sm:$0xff]  ;;  %v3557_v19 = vld [vmem:[%s4529_s1 + $0xc0] sm:$0xff]  ;;  %v3568_v22 = vld [vmem:[%s4529_s1 + $0xc8] sm:$0xff] }
  0x85   :  { %v72_v3 = vsel %vm66_vm0, %v65_v26, %v55_v62  ;;  %v2899_v32 = vunpack.i.h.bf16 %v2897_v28  ;;  %v2898_v33 = vunpack.i.l.bf16 %v2897_v28  ;;  %655 = vmatprep.mubr.f32.mxu0 %v4545_v6  ;;  %871 = vmatprep.mubr.f32.mxu1 %v4545_v6  ;;  %v3377_v62 = vld [vmem:[%s4529_s1 + $0x48] sm:$0xff]  ;;  %v3579_v23 = vld [vmem:[%s4529_s1 + $0xd0] sm:$0xff]  ;;  %v3590_v24 = vld [vmem:[%s4529_s1 + $0xd8] sm:$0xff] }
  0x86   :  { %v2566_v36 = vpack.c.bf16 %v72_v3, %v85_v27  ;;  %v3601_v25 = vld [vmem:[%s4529_s1 + $0xe0] sm:$0xff]  ;;  %v3614_v27 = vld [vmem:[%s4529_s1 + $0xe8] sm:$0xff]  ;;  %v3642_v3 = vld [vmem:[%s4529_s1 + $0xf8] sm:$0xff] }
  0x87   :  { %v67_v37 = vsel %vm66_vm0, %v2899_v32, %v65_v26  ;;  %v68_v38 = vsel %vm66_vm0, %v2898_v33, %v2899_v32  ;;  %v69_v39 = vsel %vm66_vm0, %v2889_v55, %v2898_v33  ;;  %v3318_v55 = vld [vmem:[%s4529_s1 + $0x148] sm:$0xff] }
  0x88   :  { %v2560_v41 = vpack.c.bf16 %v68_v38, %v83_v29  ;;  %v2563_v42 = vpack.c.bf16 %v69_v39, %v82_v40  ;;  %v2569_v43 = vpack.c.bf16 %v67_v37, %v84_v1  ;;  %2407 = vmatmul.mubr.msk.f32.gmra.mrb[2].mxu0 %vm422_vm5, %v3220_v34  ;;  %2443 = vmatmul.mubr.msk.f32.gmra.mrb[2].mxu1 %vm422_vm5, %v3225_v35  ;;  %v3627_v29 = vld [vmem:[%s4529_s1 + $0xf0] sm:$0xff]  ;;  %v3657_v1 = vld [vmem:[%s4529_s1 + $0x100] sm:$0xff]  ;;  %v3672_v38 = vld [vmem:[%s4529_s1 + $0x108] sm:$0xff] }
  0x89   :  { %2568 = vmatprep.subr.msk.bf16.mxu0 %vm3147_vm4, %v2566_v36  ;;  %661 = vmatprep.mubr.f32.mxu0 %v4545_v6 }
  0x8a   :  { %2562 = vmatprep.subr.msk.bf16.mxu1 %vm3147_vm4, %v2560_v41  ;;  %877 = vmatprep.mubr.f32.mxu1 %v4545_v6  ;;  %v3687_v41 = vld [vmem:[%s4529_s1 + $0x110] sm:$0xff] }
  0x8b   :  { %2565 = vmatpush1.bf16.msk.msra.mxu1 %vm3147_vm4, %v2563_v42  ;;  %2571 = vmatpush1.bf16.msk.msra.mxu0 %vm3147_vm4, %v2569_v43 }
  0x8c   :  { %2408 = vmatmul.mubr.msk.f32.gmra.mrb[4].mxu0 %vm422_vm5, %v3246_v44  ;;  %2444 = vmatmul.mubr.msk.f32.gmra.mrb[4].mxu1 %vm422_vm5, %v3251_v45 }
  0x8d   :  { %667 = vmatprep.mubr.f32.mxu0 %v4545_v6  ;;  %883 = vmatprep.mubr.f32.mxu1 %v4545_v6 }
  0x90   :  { %2409 = vmatmul.mubr.msk.f32.gmra.mrb[6].mxu0 %vm422_vm5, %v3275_v48  ;;  %2445 = vmatmul.mubr.msk.f32.gmra.mrb[6].mxu1 %vm422_vm5, %v3280_v49 }
  0x91   :  { %673 = vmatprep.mubr.f32.mxu0 %v4545_v6  ;;  %889 = vmatprep.mubr.f32.mxu1 %v4545_v6 }
  0x94   :  { %2410 = vmatmul.mubr.msk.f32.gmra.mrb[8].mxu0 %vm422_vm5, %v3297_v52  ;;  %2446 = vmatmul.mubr.msk.f32.gmra.mrb[8].mxu1 %vm422_vm5, %v3302_v53 }
  0x95   :  { %679 = vmatprep.mubr.f32.mxu0 %v4545_v6  ;;  %895 = vmatprep.mubr.f32.mxu1 %v4545_v6  ;;  %v3603_v26 = vpop.permute.xlu1 %189  ;;  %v3616_v28 = vpop.permute.xlu0 %184 }
  0x98   :  { %2411 = vmatmul.mubr.msk.f32.gmra.mrb[10].mxu0 %vm422_vm5, %v3313_v54  ;;  %2447 = vmatmul.mubr.msk.f32.gmra.mrb[10].mxu1 %vm422_vm5, %v3318_v55 }
  0x99   :  { %685 = vmatprep.mubr.f32.mxu0 %v4545_v6  ;;  %901 = vmatprep.mubr.f32.mxu1 %v4545_v6  ;;  %v3629_v30 = vpop.permute.xlu1 %194  ;;  %v3631_v31 = vpop.permute.xlu0 %199 }
  0x9c   :  { %2412 = vmatmul.mubr.msk.f32.gmra.mrb[12].mxu0 %vm422_vm5, %v3329_v56  ;;  %2448 = vmatmul.mubr.msk.f32.gmra.mrb[12].mxu1 %vm422_vm5, %v3334_v57 }
  0x9d   :  { %691 = vmatprep.mubr.f32.mxu0 %v4545_v6  ;;  %907 = vmatprep.mubr.f32.mxu1 %v4545_v6  ;;  %v3644_v32 = vpop.permute.xlu1 %204  ;;  %v3646_v33 = vpop.permute.xlu0 %209 }
  0xa0   :  { %2413 = vmatmul.mubr.msk.f32.gmra.mrb[14].mxu0 %vm422_vm5, %v3345_v58  ;;  %2449 = vmatmul.mubr.msk.f32.gmra.mrb[14].mxu1 %vm422_vm5, %v3350_v59 }
  0xa1   :  { %697 = vmatprep.mubr.f32.mxu0 %v4545_v6  ;;  %913 = vmatprep.mubr.f32.mxu1 %v4545_v6  ;;  %v3659_v36 = vpop.permute.xlu1 %214  ;;  %v3661_v37 = vpop.permute.xlu0 %219 }
  0xa4   :  { %2414 = vmatmul.mubr.msk.f32.gmra.mrb[16].mxu0 %vm422_vm5, %v3361_v60  ;;  %2450 = vmatmul.mubr.msk.f32.gmra.mrb[16].mxu1 %vm422_vm5, %v3366_v61 }
  0xa5   :  { %703 = vmatprep.mubr.f32.mxu0 %v4545_v6  ;;  %919 = vmatprep.mubr.f32.mxu1 %v4545_v6  ;;  %v3674_v39 = vpop.permute.xlu1 %224  ;;  %v3676_v40 = vpop.permute.xlu0 %229 }
  0xa6   :  { %4606 = vst [vmem:[#allocation5_spill] sm:$0xff] %v3676_v40 }
  0xa8   :  { %2415 = vmatmul.mubr.msk.f32.gmra.mrb[18].mxu0 %vm422_vm5, %v3377_v62  ;;  %2451 = vmatmul.mubr.msk.f32.gmra.mrb[18].mxu1 %vm422_vm5, %v3382_v63 }
  0xa9   :  { %709 = vmatprep.mubr.f32.mxu0 %v4545_v6  ;;  %925 = vmatprep.mubr.f32.mxu1 %v4545_v6  ;;  %v3689_v42 = vpop.permute.xlu1 %234  ;;  %v3691_v43 = vpop.permute.xlu0 %239 }
  0xaa   :  { %4607 = vst [vmem:[#allocation6_spill] sm:$0xff] %v3689_v42  ;;  %4608 = vst [vmem:[#allocation7_spill] sm:$0xff] %v3691_v43 }
  0xac   :  { %2416 = vmatmul.mubr.msk.f32.gmra.mrb[20].mxu0 %vm422_vm5, %v3393_v2  ;;  %2452 = vmatmul.mubr.msk.f32.gmra.mrb[20].mxu1 %vm422_vm5, %v3398_v4 }
  0xad   :  { %715 = vmatprep.mubr.f32.mxu0 %v4545_v6  ;;  %931 = vmatprep.mubr.f32.mxu1 %v4545_v6  ;;  %v3704_v47 = vpop.permute.xlu1 %244  ;;  %v3712_v50 = vpop.permute.xlu0 %249 }
  0xae   :  { %4609 = vst [vmem:[#allocation8_spill] sm:$0xff] %v3704_v47  ;;  %4610 = vst [vmem:[#allocation9_spill] sm:$0xff] %v3712_v50 }
  0xb0   :  { %2417 = vmatmul.mubr.msk.f32.gmra.mrb[22].mxu0 %vm422_vm5, %v3409_v5  ;;  %2453 = vmatmul.mubr.msk.f32.gmra.mrb[22].mxu1 %vm422_vm5, %v3414_v7 }
  0xb1   :  { %721 = vmatprep.mubr.f32.mxu0 %v4545_v6  ;;  %1002 = vmatprep.mubr.f32.mxu1 %v4545_v6  ;;  %v3714_v51 = vpop.permute.xlu1 %254  ;;  %v3722_v47 = vpop.permute.xlu0 %259 }
  0xb2   :  { %4611 = vst [vmem:[#allocation10_spill] sm:$0xff] %v3714_v51  ;;  %4612 = vst [vmem:[#allocation11_spill] sm:$0xff] %v3722_v47 }
  0xb4   :  { %2418 = vmatmul.mubr.msk.f32.gmra.mrb[24].mxu0 %vm422_vm5, %v3425_v8  ;;  %2456 = vmatmul.mubr.msk.f32.vlgmr.msra.gmra.mrb[24].mxu1 %vm422_vm5, %v3183_v20 }
  0xb5   :  { %727 = vmatprep.mubr.f32.mxu0 %v4545_v6  ;;  %1008 = vmatprep.mubr.f32.mxu1 %v4545_v6  ;;  %v3730_v51 = vpop.permute.xlu1 %264 }
  0xb6   :  { %4613 = vst [vmem:[#allocation12_spill] sm:$0xff] %v3730_v51 }
  0xb8   :  { %2419 = vmatmul.mubr.msk.f32.gmra.mrb[26].mxu0 %vm422_vm5, %v3436_v0  ;;  %2457 = vmatmul.mubr.msk.f32.gmra.mrb[26].mxu1 %vm422_vm5, %v3220_v34 }
  0xb9   :  { %733 = vmatprep.mubr.f32.mxu0 %v4545_v6  ;;  %1014 = vmatprep.mubr.f32.mxu1 %v4545_v6  ;;  %v3740_v47 = vpop.permute.xlu1 %274 }
  0xba   :  { %4615 = vst [vmem:[#allocation14_spill] sm:$0xff] %v3740_v47 }
  0xbc   :  { %2420 = vmatmul.mubr.msk.f32.gmra.mrb[28].mxu0 %vm422_vm5, %v3447_v9  ;;  %2458 = vmatmul.mubr.msk.f32.gmra.mrb[28].mxu1 %vm422_vm5, %v3246_v44 }
  0xbd   :  { %739 = vmatprep.mubr.f32.mxu0 %v4545_v6  ;;  %1020 = vmatprep.mubr.f32.mxu1 %v4545_v6 }
  0xc0   :  { %2421 = vmatmul.mubr.msk.f32.gmra.mrb[30].mxu0 %vm422_vm5, %v3458_v10  ;;  %2459 = vmatmul.mubr.msk.f32.gmra.mrb[30].mxu1 %vm422_vm5, %v3275_v48 }
  0xc1   :  { %745 = vmatprep.mubr.f32.mxu0 %v4545_v6  ;;  %1026 = vmatprep.mubr.f32.mxu1 %v4545_v6 }
  0xc4   :  { %2422 = vmatmul.mubr.msk.f32.gmra.mrb[32].mxu0 %vm422_vm5, %v3469_v11  ;;  %2460 = vmatmul.mubr.msk.f32.gmra.mrb[32].mxu1 %vm422_vm5, %v3297_v52 }
  0xc5   :  { %751 = vmatprep.mubr.f32.mxu0 %v4545_v6  ;;  %1032 = vmatprep.mubr.f32.mxu1 %v4545_v6 }
  0xc8   :  { %2423 = vmatmul.mubr.msk.f32.gmra.mrb[34].mxu0 %vm422_vm5, %v3480_v12  ;;  %2461 = vmatmul.mubr.msk.f32.gmra.mrb[34].mxu1 %vm422_vm5, %v3313_v54 }
  0xc9   :  { %757 = vmatprep.mubr.f32.mxu0 %v4545_v6  ;;  %1038 = vmatprep.mubr.f32.mxu1 %v4545_v6 }
  0xcc   :  { %2424 = vmatmul.mubr.msk.f32.gmra.mrb[36].mxu0 %vm422_vm5, %v3491_v13  ;;  %2462 = vmatmul.mubr.msk.f32.gmra.mrb[36].mxu1 %vm422_vm5, %v3329_v56 }
  0xcd   :  { %763 = vmatprep.mubr.f32.mxu0 %v4545_v6  ;;  %1044 = vmatprep.mubr.f32.mxu1 %v4545_v6 }
  0xd0   :  { %2425 = vmatmul.mubr.msk.f32.gmra.mrb[38].mxu0 %vm422_vm5, %v3502_v14  ;;  %2463 = vmatmul.mubr.msk.f32.gmra.mrb[38].mxu1 %vm422_vm5, %v3345_v58 }
  0xd1   :  { %769 = vmatprep.mubr.f32.mxu0 %v4545_v6  ;;  %1050 = vmatprep.mubr.f32.mxu1 %v4545_v6 }
  0xd4   :  { %2426 = vmatmul.mubr.msk.f32.gmra.mrb[40].mxu0 %vm422_vm5, %v3513_v15  ;;  %2464 = vmatmul.mubr.msk.f32.gmra.mrb[40].mxu1 %vm422_vm5, %v3361_v60 }
  0xd5   :  { %775 = vmatprep.mubr.f32.mxu0 %v4545_v6  ;;  %1056 = vmatprep.mubr.f32.mxu1 %v4545_v6 }
  0xd8   :  { %2427 = vmatmul.mubr.msk.f32.gmra.mrb[42].mxu0 %vm422_vm5, %v3524_v16  ;;  %2465 = vmatmul.mubr.msk.f32.gmra.mrb[42].mxu1 %vm422_vm5, %v3377_v62 }
  0xd9   :  { %781 = vmatprep.mubr.f32.mxu0 %v4545_v6  ;;  %1062 = vmatprep.mubr.f32.mxu1 %v4545_v6 }
  0xdc   :  { %2428 = vmatmul.mubr.msk.f32.gmra.mrb[44].mxu0 %vm422_vm5, %v3535_v17  ;;  %2466 = vmatmul.mubr.msk.f32.gmra.mrb[44].mxu1 %vm422_vm5, %v3393_v2 }
  0xdd   :  { %787 = vmatprep.mubr.f32.mxu0 %v4545_v6  ;;  %1068 = vmatprep.mubr.f32.mxu1 %v4545_v6 }
  0xe0   :  { %2429 = vmatmul.mubr.msk.f32.gmra.mrb[46].mxu0 %vm422_vm5, %v3546_v18  ;;  %2467 = vmatmul.mubr.msk.f32.gmra.mrb[46].mxu1 %vm422_vm5, %v3409_v5 }
  0xe1   :  { %793 = vmatprep.mubr.f32.mxu0 %v4545_v6  ;;  %1074 = vmatprep.mubr.f32.mxu1 %v4545_v6 }
  0xe4   :  { %2430 = vmatmul.mubr.msk.f32.gmra.mrb[48].mxu0 %vm422_vm5, %v3557_v19  ;;  %2468 = vmatmul.mubr.msk.f32.gmra.mrb[48].mxu1 %vm422_vm5, %v3425_v8 }
  0xe5   :  { %799 = vmatprep.mubr.f32.mxu0 %v4545_v6  ;;  %1080 = vmatprep.mubr.f32.mxu1 %v4545_v6 }
  0xe8   :  { %2431 = vmatmul.mubr.msk.f32.gmra.mrb[50].mxu0 %vm422_vm5, %v3568_v22  ;;  %2469 = vmatmul.mubr.msk.f32.gmra.mrb[50].mxu1 %vm422_vm5, %v3436_v0 }
  0xe9   :  { %805 = vmatprep.mubr.f32.mxu0 %v4545_v6  ;;  %1086 = vmatprep.mubr.f32.mxu1 %v4545_v6 }
  0xec   :  { %2432 = vmatmul.mubr.msk.f32.gmra.mrb[52].mxu0 %vm422_vm5, %v3579_v23  ;;  %2470 = vmatmul.mubr.msk.f32.gmra.mrb[52].mxu1 %vm422_vm5, %v3447_v9 }
  0xed   :  { %811 = vmatprep.mubr.f32.mxu0 %v4545_v6  ;;  %1092 = vmatprep.mubr.f32.mxu1 %v4545_v6 }
  0xf0   :  { %2433 = vmatmul.mubr.msk.f32.gmra.mrb[54].mxu0 %vm422_vm5, %v3590_v24  ;;  %2471 = vmatmul.mubr.msk.f32.gmra.mrb[54].mxu1 %vm422_vm5, %v3458_v10 }
  0xf1   :  { %817 = vmatprep.mubr.f32.mxu0 %v4545_v6  ;;  %1098 = vmatprep.mubr.f32.mxu1 %v4545_v6 }
  0xf4   :  { %2434 = vmatmul.mubr.msk.f32.gmra.mrb[56].mxu0 %vm422_vm5, %v3601_v25  ;;  %2472 = vmatmul.mubr.msk.f32.gmra.mrb[56].mxu1 %vm422_vm5, %v3469_v11 }
  0xf5   :  { %823 = vmatprep.mubr.f32.mxu0 %v4545_v6  ;;  %1104 = vmatprep.mubr.f32.mxu1 %v4545_v6 }
  0xf8   :  { %2435 = vmatmul.mubr.msk.f32.gmra.mrb[58].mxu0 %vm422_vm5, %v3614_v27  ;;  %2473 = vmatmul.mubr.msk.f32.gmra.mrb[58].mxu1 %vm422_vm5, %v3480_v12 }
  0xf9   :  { %829 = vmatprep.mubr.f32.mxu0 %v4545_v6  ;;  %1110 = vmatprep.mubr.f32.mxu1 %v4545_v6 }
  0xfc   :  { %2436 = vmatmul.mubr.msk.f32.gmra.mrb[60].mxu0 %vm422_vm5, %v3627_v29  ;;  %2474 = vmatmul.mubr.msk.f32.gmra.mrb[60].mxu1 %vm422_vm5, %v3491_v13 }
  0xfd   :  { %835 = vmatprep.mubr.f32.mxu0 %v4545_v6  ;;  %1116 = vmatprep.mubr.f32.mxu1 %v4545_v6 }
 0x100   :  { %2437 = vmatmul.mubr.msk.f32.gmra.mrb[62].mxu0 %vm422_vm5, %v3642_v3  ;;  %2475 = vmatmul.mubr.msk.f32.gmra.mrb[62].mxu1 %vm422_vm5, %v3502_v14 }
 0x101   :  { %841 = vmatprep.mubr.f32.mxu0 %v4545_v6  ;;  %1122 = vmatprep.mubr.f32.mxu1 %v4545_v6 }
 0x104   :  { %2438 = vmatmul.mubr.msk.f32.gmra.mrb[64].mxu0 %vm422_vm5, %v3657_v1  ;;  %2476 = vmatmul.mubr.msk.f32.gmra.mrb[64].mxu1 %vm422_vm5, %v3513_v15 }
 0x105   :  { %847 = vmatprep.mubr.f32.mxu0 %v4545_v6  ;;  %1128 = vmatprep.mubr.f32.mxu1 %v4545_v6 }
 0x108   :  { %2439 = vmatmul.mubr.msk.f32.gmra.mrb[66].mxu0 %vm422_vm5, %v3672_v38  ;;  %2477 = vmatmul.mubr.msk.f32.gmra.mrb[66].mxu1 %vm422_vm5, %v3524_v16 }
 0x109   :  { %853 = vmatprep.mubr.f32.mxu0 %v4545_v6  ;;  %1134 = vmatprep.mubr.f32.mxu1 %v4545_v6 }
 0x10c   :  { %2440 = vmatmul.mubr.msk.f32.gmra.mrb[68].mxu0 %vm422_vm5, %v3687_v41  ;;  %2478 = vmatmul.mubr.msk.f32.gmra.mrb[68].mxu1 %vm422_vm5, %v3535_v17 }
 0x10d   :  { %859 = vmatprep.mubr.f32.mxu0 %v4545_v6  ;;  %1140 = vmatprep.mubr.f32.mxu1 %v4545_v6 }
 0x110   :  { %2441 = vmatmul.mubr.msk.f32.gmra.mrb[70].mxu0 %vm422_vm5, %v3702_v46  ;;  %2479 = vmatmul.mubr.msk.f32.gmra.mrb[70].mxu1 %vm422_vm5, %v3546_v18 }
 0x111   :  { %1146 = vmatprep.mubr.f32.mxu1 %v4545_v6  ;;  %1355 = vmatprep.mubr.f32.mxu0 %v4545_v6 }
 0x114   :  { %2480 = vmatmul.mubr.msk.f32.gmra.mrb[72].mxu1 %vm422_vm5, %v3557_v19  ;;  %2506 = vmatmul.mubr.msk.f32.vlgmr.msra.gmra.mrb[72].mxu0 %vm422_vm5, %v3183_v20  ;;  %v3738_v20 = vpop.permute.xlu0 %269 }
 0x115   :  { %1152 = vmatprep.mubr.f32.mxu1 %v4545_v6  ;;  %1361 = vmatprep.mubr.f32.mxu0 %v4545_v6  ;;  %4614 = vst [vmem:[#allocation13_spill] sm:$0xff] %v3738_v20 }
 0x118   :  { %2481 = vmatmul.mubr.msk.f32.gmra.mrb[74].mxu1 %vm422_vm5, %v3568_v22  ;;  %2507 = vmatmul.mubr.msk.f32.gmra.mrb[74].mxu0 %vm422_vm5, %v3220_v34  ;;  %v3748_v34 = vpop.permute.xlu0 %279 }
 0x119   :  { %1158 = vmatprep.mubr.f32.mxu1 %v4545_v6  ;;  %1367 = vmatprep.mubr.f32.mxu0 %v4545_v6  ;;  %4616 = vst [vmem:[#allocation15_spill] sm:$0xff] %v3748_v34 }
 0x11c   :  { %2482 = vmatmul.mubr.msk.f32.gmra.mrb[76].mxu1 %vm422_vm5, %v3579_v23  ;;  %2508 = vmatmul.mubr.msk.f32.gmra.mrb[76].mxu0 %vm422_vm5, %v3246_v44  ;;  %v3756_v44 = vpop.permute.xlu1 %284 }
 0x11d   :  { %1164 = vmatprep.mubr.f32.mxu1 %v4545_v6  ;;  %1373 = vmatprep.mubr.f32.mxu0 %v4545_v6  ;;  %4617 = vst [vmem:[#allocation16_spill] sm:$0xff] %v3756_v44 }
 0x120   :  { %2483 = vmatmul.mubr.msk.f32.gmra.mrb[78].mxu1 %vm422_vm5, %v3590_v24  ;;  %2509 = vmatmul.mubr.msk.f32.gmra.mrb[78].mxu0 %vm422_vm5, %v3275_v48  ;;  %v3764_v48 = vpop.permute.xlu0 %289  ;;  %v3766_v34 = vpop.permute.xlu1 %294 }
 0x121   :  { %1170 = vmatprep.mubr.f32.mxu1 %v4545_v6  ;;  %1379 = vmatprep.mubr.f32.mxu0 %v4545_v6  ;;  %4618 = vst [vmem:[#allocation17_spill] sm:$0xff] %v3764_v48  ;;  %4619 = vst [vmem:[#allocation18_spill] sm:$0xff] %v3766_v34 }
 0x124   :  { %2484 = vmatmul.mubr.msk.f32.gmra.mrb[80].mxu1 %vm422_vm5, %v3601_v25  ;;  %2510 = vmatmul.mubr.msk.f32.gmra.mrb[80].mxu0 %vm422_vm5, %v3297_v52  ;;  %v3774_v52 = vpop.permute.xlu0 %299 }
 0x125   :  { %1176 = vmatprep.mubr.f32.mxu1 %v4545_v6  ;;  %1385 = vmatprep.mubr.f32.mxu0 %v4545_v6  ;;  %4620 = vst [vmem:[#allocation19_spill] sm:$0xff] %v3774_v52 }
 0x128   :  { %2485 = vmatmul.mubr.msk.f32.gmra.mrb[82].mxu1 %vm422_vm5, %v3614_v27  ;;  %2511 = vmatmul.mubr.msk.f32.gmra.mrb[82].mxu0 %vm422_vm5, %v3313_v54  ;;  %v3782_v54 = vpop.permute.xlu1 %304 }
 0x129   :  { %1182 = vmatprep.mubr.f32.mxu1 %v4545_v6  ;;  %1391 = vmatprep.mubr.f32.mxu0 %v4545_v6  ;;  %4621 = vst [vmem:[#allocation20_spill] sm:$0xff] %v3782_v54 }
 0x12c   :  { %2486 = vmatmul.mubr.msk.f32.gmra.mrb[84].mxu1 %vm422_vm5, %v3627_v29  ;;  %2512 = vmatmul.mubr.msk.f32.gmra.mrb[84].mxu0 %vm422_vm5, %v3329_v56  ;;  %v3790_v56 = vpop.permute.xlu0 %309  ;;  %v3792_v52 = vpop.permute.xlu1 %314 }
 0x12d   :  { %1188 = vmatprep.mubr.f32.mxu1 %v4545_v6  ;;  %1397 = vmatprep.mubr.f32.mxu0 %v4545_v6  ;;  %4622 = vst [vmem:[#allocation21_spill] sm:$0xff] %v3790_v56  ;;  %4623 = vst [vmem:[#allocation22_spill] sm:$0xff] %v3792_v52 }
 0x130   :  { %2487 = vmatmul.mubr.msk.f32.gmra.mrb[86].mxu1 %vm422_vm5, %v3642_v3  ;;  %2513 = vmatmul.mubr.msk.f32.gmra.mrb[86].mxu0 %vm422_vm5, %v3345_v58  ;;  %v3800_v58 = vpop.permute.xlu0 %319 }
 0x131   :  { %1194 = vmatprep.mubr.f32.mxu1 %v4545_v6  ;;  %1403 = vmatprep.mubr.f32.mxu0 %v4545_v6  ;;  %4624 = vst [vmem:[#allocation23_spill] sm:$0xff] %v3800_v58 }
 0x134   :  { %2488 = vmatmul.mubr.msk.f32.gmra.mrb[88].mxu1 %vm422_vm5, %v3657_v1  ;;  %2514 = vmatmul.mubr.msk.f32.gmra.mrb[88].mxu0 %vm422_vm5, %v3361_v60  ;;  %v3808_v60 = vpop.permute.xlu1 %324 }
 0x135   :  { %1200 = vmatprep.mubr.f32.mxu1 %v4545_v6  ;;  %1409 = vmatprep.mubr.f32.mxu0 %v4545_v6  ;;  %4625 = vst [vmem:[#allocation24_spill] sm:$0xff] %v3808_v60 }
 0x138   :  { %2489 = vmatmul.mubr.msk.f32.gmra.mrb[90].mxu1 %vm422_vm5, %v3672_v38  ;;  %2515 = vmatmul.mubr.msk.f32.gmra.mrb[90].mxu0 %vm422_vm5, %v3377_v62  ;;  %v3816_v62 = vpop.permute.xlu0 %329  ;;  %v3818_v58 = vpop.permute.xlu1 %334 }
 0x139   :  { %1206 = vmatprep.mubr.f32.mxu1 %v4545_v6  ;;  %1415 = vmatprep.mubr.f32.mxu0 %v4545_v6  ;;  %4626 = vst [vmem:[#allocation25_spill] sm:$0xff] %v3816_v62  ;;  %4627 = vst [vmem:[#allocation26_spill] sm:$0xff] %v3818_v58 }
 0x13c   :  { %2490 = vmatmul.mubr.msk.f32.gmra.mrb[92].mxu1 %vm422_vm5, %v3687_v41  ;;  %2516 = vmatmul.mubr.msk.f32.gmra.mrb[92].mxu0 %vm422_vm5, %v3393_v2  ;;  %v3826_v2 = vpop.permute.xlu0 %339 }
 0x13d   :  { %1212 = vmatprep.mubr.f32.mxu1 %v4545_v6  ;;  %1421 = vmatprep.mubr.f32.mxu0 %v4545_v6  ;;  %4628 = vst [vmem:[#allocation27_spill] sm:$0xff] %v3826_v2 }
 0x140   :  { %2491 = vmatmul.mubr.msk.f32.gmra.mrb[94].mxu1 %vm422_vm5, %v3702_v46  ;;  %2517 = vmatmul.mubr.msk.f32.gmra.mrb[94].mxu0 %vm422_vm5, %v3409_v5 }
 0x141   :  { %1218 = vmatprep.mubr.f32.mxu1 %v4545_v6  ;;  %1427 = vmatprep.mubr.f32.mxu0 %v4545_v6 }
 0x144   :  { %2492 = vmatmul.mubr.msk.f32.gmra.mrb[96].mxu1 %vm422_vm5, %v3188_v21  ;;  %2518 = vmatmul.mubr.msk.f32.gmra.mrb[96].mxu0 %vm422_vm5, %v3425_v8  ;;  %v3834_v21 = vpop.permute.xlu1 %344 }
 0x145   :  { %1224 = vmatprep.mubr.f32.mxu1 %v4545_v6  ;;  %1433 = vmatprep.mubr.f32.mxu0 %v4545_v6  ;;  %4629 = vst [vmem:[#allocation28_spill] sm:$0xff] %v3834_v21 }
 0x148   :  { %2493 = vmatmul.mubr.msk.f32.gmra.mrb[98].mxu1 %vm422_vm5, %v3225_v35  ;;  %2519 = vmatmul.mubr.msk.f32.gmra.mrb[98].mxu0 %vm422_vm5, %v3436_v0  ;;  %v3842_v35 = vpop.permute.xlu0 %349  ;;  %v3844_v5 = vpop.permute.xlu1 %354 }
 0x149   :  { %1230 = vmatprep.mubr.f32.mxu1 %v4545_v6  ;;  %1439 = vmatprep.mubr.f32.mxu0 %v4545_v6  ;;  %4630 = vst [vmem:[#allocation29_spill] sm:$0xff] %v3842_v35  ;;  %4631 = vst [vmem:[#allocation30_spill] sm:$0xff] %v3844_v5 }
 0x14c   :  { %2494 = vmatmul.mubr.msk.f32.gmra.mrb[100].mxu1 %vm422_vm5, %v3251_v45  ;;  %2520 = vmatmul.mubr.msk.f32.gmra.mrb[100].mxu0 %vm422_vm5, %v3447_v9  ;;  %v3852_v45 = vpop.permute.xlu0 %359 }
 0x14d   :  { %1236 = vmatprep.mubr.f32.mxu1 %v4545_v6  ;;  %1445 = vmatprep.mubr.f32.mxu0 %v4545_v6  ;;  %4632 = vst [vmem:[#allocation31_spill] sm:$0xff] %v3852_v45 }
 0x150   :  { %2495 = vmatmul.mubr.msk.f32.gmra.mrb[102].mxu1 %vm422_vm5, %v3280_v49  ;;  %2521 = vmatmul.mubr.msk.f32.gmra.mrb[102].mxu0 %vm422_vm5, %v3458_v10  ;;  %v3860_v49 = vpop.permute.xlu1 %364 }
 0x151   :  { %1242 = vmatprep.mubr.f32.mxu1 %v4545_v6  ;;  %1451 = vmatprep.mubr.f32.mxu0 %v4545_v6  ;;  %4633 = vst [vmem:[#allocation32_spill] sm:$0xff] %v3860_v49 }
 0x154   :  { %2496 = vmatmul.mubr.msk.f32.gmra.mrb[104].mxu1 %vm422_vm5, %v3302_v53  ;;  %2522 = vmatmul.mubr.msk.f32.gmra.mrb[104].mxu0 %vm422_vm5, %v3469_v11  ;;  %v3869_v11 = vpop.permute.xlu0 %369  ;;  %v3884_v60 = vpop.permute.xlu1 %374 }
 0x155   :  { %1248 = vmatprep.mubr.f32.mxu1 %v4545_v6  ;;  %1457 = vmatprep.mubr.f32.mxu0 %v4545_v6  ;;  %4634 = vst [vmem:[#allocation33_spill] sm:$0xff] %v3869_v11  ;;  %4636 = vst [vmem:[#allocation34_spill] sm:$0xff] %v3884_v60 }
 0x157   :  { %v651_v8 = vpop.f32.mrb[0].mxu0  ;;  %v867_v0 = vpop.f32.mrb[0].mxu1 }
 0x158   :  { %v653_v9 = vpop.f32.mrb[1].mxu0  ;;  %2497 = vmatmul.mubr.msk.f32.gmra.mrb[106].mxu1 %vm422_vm5, %v3318_v55  ;;  %2523 = vmatmul.mubr.msk.f32.gmra.mrb[106].mxu0 %vm422_vm5, %v3480_v12  ;;  %v869_v10 = vpop.f32.mrb[1].mxu1  ;;  %v868_v53 = vadd.f32 %v867_v0, %v3860_v49  ;;  %v652_v5 = vadd.f32 %v651_v8, %v3616_v28  ;;  %v4635_v8 = vmov 0.0  }
 0x159   :  { %1254 = vmatprep.mubr.f32.mxu1 %v4545_v6  ;;  %1463 = vmatprep.mubr.f32.mxu0 %v4545_v6  ;;  %v870_v45 = vadd.f32 %v869_v10, %v3860_v49  ;;  %v654_v35 = vadd.f32 %v653_v9, %v3616_v28 }
 0x15a   :  { %v1860_v58 = vmax.f32 %v868_v53, 0.0  ;;  %v1644_v49 = vmax.f32 %v652_v5, 0.0 }
 0x15b   :  { %v657_v21 = vpop.f32.mrb[2].mxu0  ;;  %v873_v55 = vpop.f32.mrb[2].mxu1  ;;  %v1645_v52 = vmax.f32 %v654_v35, 0.0 }
 0x15c   :  { %v658_v2 = vadd.f32 %v657_v21, %v3603_v26  ;;  %v659_v12 = vpop.f32.mrb[3].mxu0  ;;  %2498 = vmatmul.mubr.msk.f32.gmra.mrb[108].mxu1 %vm422_vm5, %v3334_v57  ;;  %2524 = vmatmul.mubr.msk.f32.gmra.mrb[108].mxu0 %vm422_vm5, %v3491_v13  ;;  %v875_v0 = vpop.f32.mrb[3].mxu1  ;;  %v874_v6 = vadd.f32 %v873_v55, %v3869_v11  ;;  %v1861_v21 = vmax.f32 %v870_v45, 0.0 }
 0x15d   :  { %v660_v10 = vadd.f32 %v659_v12, %v3603_v26  ;;  %1260 = vmatprep.mubr.f32.mxu1 %v4635_v8  ;;  %1469 = vmatprep.mubr.f32.mxu0 %v4635_v8  ;;  %v876_v9 = vadd.f32 %v875_v0, %v3869_v11 }
 0x15e   :  { %v1650_v62 = vmax.f32 %v658_v2, 0.0  ;;  %v1866_v57 = vmax.f32 %v874_v6, 0.0  ;;  %v3894_v6 = vpop.permute.xlu0 %379 }
 0x15f   :  { %v1651_v13 = vmax.f32 %v660_v10, 0.0  ;;  %v663_v56 = vpop.f32.mrb[4].mxu0  ;;  %v879_v54 = vpop.f32.mrb[4].mxu1  ;;  %v1867_v55 = vmax.f32 %v876_v9, 0.0  ;;  %4637 = vst [vmem:[#allocation35_spill] sm:$0xff] %v3894_v6 }
 0x160   :  { %v2574_v53 = vpack.c.bf16 %v1650_v62, %v1644_v49  ;;  %v665_v34 = vpop.f32.mrb[5].mxu0  ;;  %2499 = vmatmul.mubr.msk.f32.gmra.mrb[110].mxu1 %vm422_vm5, %v3350_v59  ;;  %2525 = vmatmul.mubr.msk.f32.gmra.mrb[110].mxu0 %vm422_vm5, %v3502_v14  ;;  %v881_v12 = vpop.f32.mrb[5].mxu1  ;;  %v3890_v45 = vpack.c.bf16 %v1866_v57, %v1860_v58  ;;  %v664_v62 = vadd.f32 %v663_v56, %v3629_v30 }
 0x161   :  { %v2572_v2 = vpack.c.bf16 %v1651_v13, %v1645_v52  ;;  %1266 = vmatprep.mubr.f32.mxu1 %v4635_v8  ;;  %1475 = vmatprep.mubr.f32.mxu0 %v4635_v8  ;;  %v3896_v35 = vpack.c.bf16 %v1867_v55, %v1861_v21  ;;  %v882_v5 = vadd.f32 %v881_v12, %v3884_v60 }
 0x162   :  { %v880_v59 = vadd.f32 %v879_v54, %v3884_v60  ;;  %v666_v14 = vadd.f32 %v665_v34, %v3629_v30  ;;  %v1656_v57 = vmax.f32 %v664_v62, 0.0 }
 0x163   :  { %v669_v49 = vpop.f32.mrb[6].mxu0  ;;  %2573 = vmatprep.subr.bf16.mxu1 %v2572_v2  ;;  %v885_v58 = vpop.f32.mrb[6].mxu1  ;;  %v1873_v21 = vmax.f32 %v882_v5, 0.0 }
 0x164   :  { %v670_v52 = vadd.f32 %v669_v49, %v3631_v31  ;;  %v671_v0 = vpop.f32.mrb[7].mxu0  ;;  %2500 = vmatmul.mubr.msk.f32.gmra.mrb[112].mxu1 %vm422_vm5, %v3366_v61  ;;  %2526 = vmatmul.mubr.msk.f32.gmra.mrb[112].mxu0 %vm422_vm5, %v3513_v15  ;;  %v887_v10 = vpop.f32.mrb[7].mxu1  ;;  %v886_v56 = vadd.f32 %v885_v58, %v3894_v6  ;;  %v1872_v9 = vmax.f32 %v880_v59, 0.0  ;;  %v1657_v15 = vmax.f32 %v666_v14, 0.0 }
 0x165   :  { %v672_v54 = vadd.f32 %v671_v0, %v3631_v31  ;;  %2575 = vmatpush1.bf16.msra.mxu1 %v2574_v53  ;;  %1272 = vmatprep.mubr.f32.mxu1 %v4635_v8  ;;  %v888_v34 = vadd.f32 %v887_v10, %v3894_v6  ;;  %v3912_v61 = vpop.permute.xlu1 %384  ;;  %v3922_v14 = vpop.permute.xlu0 %389 }
 0x166   :  { %v1662_v13 = vmax.f32 %v670_v52, 0.0  ;;  %1481 = vmatprep.mubr.f32.mxu0 %v4635_v8  ;;  %4638 = vst [vmem:[#allocation36_spill] sm:$0xff] %v3912_v61  ;;  %v1878_v55 = vmax.f32 %v886_v56, 0.0  ;;  %4639 = vst [vmem:[#allocation37_spill] sm:$0xff] %v3922_v14 }
 0x167   :  { %v1663_v12 = vmax.f32 %v672_v54, 0.0  ;;  %v675_v2 = vpop.f32.mrb[8].mxu0  ;;  %v891_v49 = vpop.f32.mrb[8].mxu1  ;;  %v1879_v59 = vmax.f32 %v888_v34, 0.0 }
 0x168   :  { %v2578_v58 = vpack.c.bf16 %v1662_v13, %v1656_v57  ;;  %v677_v0 = vpop.f32.mrb[9].mxu0  ;;  %2501 = vmatmul.mubr.msk.f32.gmra.mrb[114].mxu1 %vm422_vm5, %v3382_v63  ;;  %2527 = vmatmul.mubr.msk.f32.gmra.mrb[114].mxu0 %vm422_vm5, %v3524_v16  ;;  %v893_v53 = vpop.f32.mrb[9].mxu1  ;;  %v3918_v62 = vpack.c.bf16 %v1878_v55, %v1872_v9  ;;  %v676_v10 = vadd.f32 %v675_v2, %v3644_v32  ;;  %v3930_v63 = vld [vmem:[%s4531_s3] sm:$0x77] }
 0x169   :  { %v2576_v5 = vpack.c.bf16 %v1663_v12, %v1657_v15  ;;  %1278 = vmatprep.mubr.f32.mxu1 %v4635_v8  ;;  %1487 = vmatprep.mubr.f32.mxu0 %v4635_v8  ;;  %v3924_v52 = vpack.c.bf16 %v1879_v59, %v1873_v21  ;;  %v894_v16 = vadd.f32 %v893_v53, %v3912_v61 }
 0x16a   :  { %v892_v56 = vadd.f32 %v891_v49, %v3912_v61  ;;  %v678_v9 = vadd.f32 %v677_v0, %v3644_v32  ;;  %v3945_v2 = vcombine.high %v3930_v63, %v3930_v63 }
 0x16b   :  { %v681_v54 = vpop.f32.mrb[10].mxu0  ;;  %2577 = vmatprep.subr.bf16.mxu1 %v2576_v5  ;;  %v897_v34 = vpop.f32.mrb[10].mxu1  ;;  %v1885_v59 = vmax.f32 %v894_v16, 0.0 }
 0x16c   :  { %v682_v57 = vadd.f32 %v681_v54, %v3646_v33  ;;  %v683_v21 = vpop.f32.mrb[11].mxu0  ;;  %2502 = vmatmul.mubr.msk.f32.gmra.mrb[116].mxu1 %vm422_vm5, %v3398_v4  ;;  %2528 = vmatmul.mubr.msk.f32.gmra.mrb[116].mxu0 %vm422_vm5, %v3535_v17  ;;  %v899_v13 = vpop.f32.mrb[11].mxu1  ;;  %v898_v55 = vadd.f32 %v897_v34, %v3922_v14  ;;  %v1884_v15 = vmax.f32 %v892_v56, 0.0  ;;  %4640 = vst [vmem:[#allocation38_spill] sm:$0xff] %v3945_v2  ;;  %v1668_v4 = vmax.f32 %v676_v10, 0.0 }
 0x16d   :  { %v684_v12 = vadd.f32 %v683_v21, %v3646_v33  ;;  %2579 = vmatpush1.bf16.msra.mxu1 %v2578_v58  ;;  %1284 = vmatprep.mubr.f32.mxu1 %v4635_v8  ;;  %v900_v49 = vadd.f32 %v899_v13, %v3922_v14  ;;  %v3949_v17 = vpop.permute.xlu1 %394  ;;  %v1669_v5 = vmax.f32 %v678_v9, 0.0  ;;  %v3958_v13 = vpop.permute.xlu0 %399 }
 0x16e   :  { %v1674_v0 = vmax.f32 %v682_v57, 0.0  ;;  %1493 = vmatprep.mubr.f32.mxu0 %v4635_v8  ;;  %4641 = vst [vmem:[#allocation39_spill] sm:$0xff] %v3949_v17  ;;  %v1890_v53 = vmax.f32 %v898_v55, 0.0  ;;  %4642 = vst [vmem:[#allocation40_spill] sm:$0xff] %v3958_v13 }
 0x16f   :  { %v1675_v56 = vmax.f32 %v684_v12, 0.0  ;;  %v687_v54 = vpop.f32.mrb[12].mxu0  ;;  %v903_v58 = vpop.f32.mrb[12].mxu1  ;;  %v1891_v34 = vmax.f32 %v900_v49, 0.0 }
 0x170   :  { %v2582_v21 = vpack.c.bf16 %v1674_v0, %v1668_v4  ;;  %v689_v61 = vpop.f32.mrb[13].mxu0  ;;  %2503 = vmatmul.mubr.msk.f32.gmra.mrb[118].mxu1 %vm422_vm5, %v3414_v7  ;;  %2529 = vmatmul.mubr.msk.f32.gmra.mrb[118].mxu0 %vm422_vm5, %v3546_v18  ;;  %v905_v10 = vpop.f32.mrb[13].mxu1  ;;  %v3955_v16 = vpack.c.bf16 %v1890_v53, %v1884_v15  ;;  %v688_v55 = vadd.f32 %v687_v54, %v3659_v36 }
 0x171   :  { %v2580_v57 = vpack.c.bf16 %v1675_v56, %v1669_v5  ;;  %1499 = vmatprep.mubr.f32.mxu0 %v4635_v8  ;;  %2007 = vmatprep.mubr.f32.mxu1 %v3945_v2  ;;  %v3961_v9 = vpack.c.bf16 %v1891_v34, %v1885_v59  ;;  %v906_v12 = vadd.f32 %v905_v10, %v3949_v17  ;;  %v3973_v54 = vpop.permute.xlu1 %404 }
 0x172   :  { %v904_v7 = vadd.f32 %v903_v58, %v3949_v17  ;;  %v690_v18 = vadd.f32 %v689_v61, %v3659_v36  ;;  %4643 = vst [vmem:[#allocation41_spill] sm:$0xff] %v3973_v54  ;;  %v1680_v34 = vmax.f32 %v688_v55, 0.0  ;;  %v3982_v55 = vpop.permute.xlu0 %409 }
 0x173   :  { %v693_v49 = vpop.f32.mrb[14].mxu0  ;;  %2581 = vmatprep.subr.bf16.mxu1 %v2580_v57  ;;  %v909_v15 = vpop.f32.mrb[14].mxu1  ;;  %v1897_v58 = vmax.f32 %v906_v12, 0.0  ;;  %4644 = vst [vmem:[#allocation42_spill] sm:$0xff] %v3982_v55 }
 0x174   :  { %v694_v4 = vadd.f32 %v693_v49, %v3661_v37  ;;  %v695_v0 = vpop.f32.mrb[15].mxu0  ;;  %2530 = vmatmul.mubr.msk.f32.gmra.mrb[120].mxu0 %vm422_vm5, %v3557_v19  ;;  %2583 = vmatpush1.bf16.msra.mxu1 %v2582_v21  ;;  %v911_v59 = vpop.f32.mrb[15].mxu1  ;;  %v910_v53 = vadd.f32 %v909_v15, %v3958_v13  ;;  %v1896_v5 = vmax.f32 %v904_v7, 0.0  ;;  %v1681_v49 = vmax.f32 %v690_v18, 0.0 }
 0x175   :  { %v696_v56 = vadd.f32 %v695_v0, %v3661_v37  ;;  %1505 = vmatprep.mubr.f32.mxu0 %v4635_v8  ;;  %v912_v61 = vadd.f32 %v911_v59, %v3958_v13 }
 0x176   :  { %v1686_v10 = vmax.f32 %v694_v4, 0.0  ;;  %v1902_v57 = vmax.f32 %v910_v53, 0.0 }
 0x177   :  { %v1687_v17 = vmax.f32 %v696_v56, 0.0  ;;  %v699_v19 = vpop.f32.mrb[16].mxu0  ;;  %v915_v21 = vpop.f32.mrb[16].mxu1  ;;  %v1903_v14 = vmax.f32 %v912_v61, 0.0 }
 0x178   :  { %v2586_v6 = vpack.c.bf16 %v1686_v10, %v1680_v34  ;;  %v701_v15 = vpop.f32.mrb[17].mxu0  ;;  %2531 = vmatmul.mubr.msk.f32.gmra.mrb[122].mxu0 %vm422_vm5, %v3568_v22  ;;  %v917_v7 = vpop.f32.mrb[17].mxu1  ;;  %v3978_v0 = vpack.c.bf16 %v1902_v57, %v1896_v5  ;;  %v916_v60 = vadd.f32 %v915_v21, %v3973_v54  ;;  %v700_v4 = vadd.f32 %v699_v19, %v3674_v39 }
 0x179   :  { %v2584_v59 = vpack.c.bf16 %v1687_v17, %v1681_v49  ;;  %1511 = vmatprep.mubr.f32.mxu0 %v4635_v8  ;;  %v3984_v12 = vpack.c.bf16 %v1903_v14, %v1897_v58  ;;  %v918_v18 = vadd.f32 %v917_v7, %v3973_v54  ;;  %v702_v53 = vadd.f32 %v701_v15, %v3674_v39  ;;  %v3995_v10 = vpop.permute.xlu1 %414 }
 0x17a   :  { %v1908_v58 = vmax.f32 %v916_v60, 0.0  ;;  %4645 = vst [vmem:[#allocation43_spill] sm:$0xff] %v3995_v10  ;;  %v1692_v19 = vmax.f32 %v700_v4, 0.0 }
 0x17b   :  { %v705_v56 = vpop.f32.mrb[18].mxu0  ;;  %2585 = vmatprep.subr.bf16.mxu1 %v2584_v59  ;;  %v921_v22 = vpop.f32.mrb[18].mxu1  ;;  %v1909_v49 = vmax.f32 %v918_v18, 0.0  ;;  %v1693_v7 = vmax.f32 %v702_v53, 0.0 }
 0x17c   :  { %v706_v5 = vadd.f32 %v705_v56, %v3676_v40  ;;  %v707_v61 = vpop.f32.mrb[19].mxu0  ;;  %2532 = vmatmul.mubr.msk.f32.gmra.mrb[124].mxu0 %vm422_vm5, %v3579_v23  ;;  %2587 = vmatpush1.bf16.msra.mxu1 %v2586_v6  ;;  %v923_v17 = vpop.f32.mrb[19].mxu1  ;;  %v922_v14 = vadd.f32 %v921_v22, %v3982_v55 }
 0x17d   :  { %v708_v34 = vadd.f32 %v707_v61, %v3676_v40  ;;  %1517 = vmatprep.mubr.f32.mxu0 %v4635_v8  ;;  %v924_v57 = vadd.f32 %v923_v17, %v3982_v55  ;;  %v4004_v18 = vpop.permute.xlu0 %419 }
 0x17e   :  { %v1698_v21 = vmax.f32 %v706_v5, 0.0  ;;  %v1914_v15 = vmax.f32 %v922_v14, 0.0  ;;  %4646 = vst [vmem:[#allocation44_spill] sm:$0xff] %v4004_v18 }
 0x17f   :  { %v1699_v59 = vmax.f32 %v708_v34, 0.0  ;;  %v711_v23 = vpop.f32.mrb[20].mxu0  ;;  %v927_v6 = vpop.f32.mrb[20].mxu1  ;;  %v1915_v56 = vmax.f32 %v924_v57, 0.0 }
 0x180   :  { %v2590_v54 = vpack.c.bf16 %v1698_v21, %v1692_v19  ;;  %v713_v22 = vpop.f32.mrb[21].mxu0  ;;  %2533 = vmatmul.mubr.msk.f32.gmra.mrb[126].mxu0 %vm422_vm5, %v3590_v24  ;;  %v929_v60 = vpop.f32.mrb[21].mxu1  ;;  %v4000_v61 = vpack.c.bf16 %v1914_v15, %v1908_v58  ;;  %v928_v13 = vadd.f32 %v927_v6, %v3995_v10  ;;  %v712_v5 = vadd.f32 %v711_v23, %v3689_v42 }
 0x181   :  { %v2588_v17 = vpack.c.bf16 %v1699_v59, %v1693_v7  ;;  %1523 = vmatprep.mubr.f32.mxu0 %v4635_v8  ;;  %v4006_v4 = vpack.c.bf16 %v1915_v56, %v1909_v49  ;;  %v930_v53 = vadd.f32 %v929_v60, %v3995_v10  ;;  %v714_v14 = vadd.f32 %v713_v22, %v3689_v42 }
 0x182   :  { %v1920_v21 = vmax.f32 %v928_v13, 0.0  ;;  %v1704_v23 = vmax.f32 %v712_v5, 0.0 }
 0x183   :  { %v717_v34 = vpop.f32.mrb[22].mxu0  ;;  %2589 = vmatprep.subr.bf16.mxu1 %v2588_v17  ;;  %v933_v24 = vpop.f32.mrb[22].mxu1  ;;  %v1921_v59 = vmax.f32 %v930_v53, 0.0  ;;  %v1705_v22 = vmax.f32 %v714_v14, 0.0  ;;  %v4647_v14 = vld [vmem:[#allocation8_spill] sm:$0xff] }
 0x184   :  { %v718_v58 = vadd.f32 %v717_v34, %v3691_v43  ;;  %v719_v57 = vpop.f32.mrb[23].mxu0  ;;  %2534 = vmatmul.mubr.msk.f32.gmra.mrb[128].mxu0 %vm422_vm5, %v3601_v25  ;;  %2591 = vmatpush1.bf16.msra.mxu1 %v2590_v54  ;;  %v935_v19 = vpop.f32.mrb[23].mxu1  ;;  %v934_v49 = vadd.f32 %v933_v24, %v4004_v18 }
 0x185   :  { %v720_v15 = vadd.f32 %v719_v57, %v3691_v43  ;;  %1529 = vmatprep.mubr.f32.mxu0 %v4635_v8  ;;  %v936_v7 = vadd.f32 %v935_v19, %v4004_v18 }
 0x186   :  { %v1710_v6 = vmax.f32 %v718_v58, 0.0  ;;  %v1926_v56 = vmax.f32 %v934_v49, 0.0 }
 0x187   :  { %v1711_v60 = vmax.f32 %v720_v15, 0.0  ;;  %v723_v17 = vpop.f32.mrb[24].mxu0  ;;  %v1004_v34 = vpop.f32.mrb[24].mxu1  ;;  %v1927_v25 = vmax.f32 %v936_v7, 0.0 }
 0x188   :  { %v2594_v54 = vpack.c.bf16 %v1710_v6, %v1704_v23  ;;  %v725_v10 = vpop.f32.mrb[25].mxu0  ;;  %2535 = vmatmul.mubr.msk.f32.gmra.mrb[130].mxu0 %vm422_vm5, %v3614_v27  ;;  %v1005_v13 = vadd.f32 %v1004_v34, %v3616_v28  ;;  %v1006_v24 = vpop.f32.mrb[25].mxu1  ;;  %v4021_v57 = vpack.c.bf16 %v1926_v56, %v1920_v21  ;;  %v724_v58 = vadd.f32 %v723_v17, %v4647_v14 }
 0x189   :  { %v2592_v19 = vpack.c.bf16 %v1711_v60, %v1705_v22  ;;  %v1007_v53 = vadd.f32 %v1006_v24, %v3616_v28  ;;  %1535 = vmatprep.mubr.f32.mxu0 %v4635_v8  ;;  %v4025_v5 = vpack.c.bf16 %v1927_v25, %v1921_v59  ;;  %v726_v49 = vadd.f32 %v725_v10, %v4647_v14 }
 0x18a   :  { %v1646_v27 = vmax.f32 %v1005_v13, 0.0  ;;  %v1716_v10 = vmax.f32 %v724_v58, 0.0 }
 0x18b   :  { %v729_v15 = vpop.f32.mrb[26].mxu0  ;;  %v1010_v7 = vpop.f32.mrb[26].mxu1  ;;  %2593 = vmatprep.subr.bf16.mxu1 %v2592_v19  ;;  %v1647_v59 = vmax.f32 %v1007_v53, 0.0  ;;  %v1717_v25 = vmax.f32 %v726_v49, 0.0  ;;  %v4648_v49 = vld [vmem:[#allocation10_spill] sm:$0xff] }
 0x18c   :  { %v730_v23 = vadd.f32 %v729_v15, %v3712_v50  ;;  %v1011_v21 = vadd.f32 %v1010_v7, %v3603_v26  ;;  %v731_v6 = vpop.f32.mrb[27].mxu0  ;;  %v1012_v56 = vpop.f32.mrb[27].mxu1  ;;  %2536 = vmatmul.mubr.msk.f32.gmra.mrb[132].mxu0 %vm422_vm5, %v3627_v29  ;;  %2595 = vmatpush1.bf16.msra.mxu1 %v2594_v54 }
 0x18d   :  { %v732_v22 = vadd.f32 %v731_v6, %v3712_v50  ;;  %v1013_v60 = vadd.f32 %v1012_v56, %v3603_v26  ;;  %1541 = vmatprep.mubr.f32.mxu0 %v4635_v8 }
 0x18e   :  { %v1722_v17 = vmax.f32 %v730_v23, 0.0  ;;  %v1652_v34 = vmax.f32 %v1011_v21, 0.0 }
 0x18f   :  { %v1723_v13 = vmax.f32 %v732_v22, 0.0  ;;  %v1653_v24 = vmax.f32 %v1013_v60, 0.0  ;;  %v735_v19 = vpop.f32.mrb[28].mxu0  ;;  %v1016_v15 = vpop.f32.mrb[28].mxu1 }
 0x190   :  { %v2598_v7 = vpack.c.bf16 %v1722_v17, %v1716_v10  ;;  %v4036_v18 = vpack.c.bf16 %v1652_v34, %v1646_v27  ;;  %v1017_v29 = vadd.f32 %v1016_v15, %v3629_v30  ;;  %v737_v54 = vpop.f32.mrb[29].mxu0  ;;  %v1018_v53 = vpop.f32.mrb[29].mxu1  ;;  %2537 = vmatmul.mubr.msk.f32.gmra.mrb[134].mxu0 %vm422_vm5, %v3642_v3  ;;  %v736_v23 = vadd.f32 %v735_v19, %v4648_v49  ;;  %v4649_v10 = vld [vmem:[#allocation11_spill] sm:$0xff] }
 0x191   :  { %v2596_v6 = vpack.c.bf16 %v1723_v13, %v1717_v25  ;;  %v4041_v56 = vpack.c.bf16 %v1653_v24, %v1647_v59  ;;  %v1019_v58 = vadd.f32 %v1018_v53, %v3629_v30  ;;  %1547 = vmatprep.mubr.f32.mxu0 %v4635_v8  ;;  %v738_v21 = vadd.f32 %v737_v54, %v4648_v49 }
 0x192   :  { %v1658_v60 = vmax.f32 %v1017_v29, 0.0  ;;  %v1728_v19 = vmax.f32 %v736_v23, 0.0 }
 0x193   :  { %v741_v27 = vpop.f32.mrb[30].mxu0  ;;  %v1022_v22 = vpop.f32.mrb[30].mxu1  ;;  %2597 = vmatprep.subr.bf16.mxu1 %v2596_v6  ;;  %v1659_v59 = vmax.f32 %v1019_v58, 0.0  ;;  %v1729_v54 = vmax.f32 %v738_v21, 0.0 }
 0x194   :  { %v742_v17 = vadd.f32 %v741_v27, %v4649_v10  ;;  %v1023_v34 = vadd.f32 %v1022_v22, %v3631_v31  ;;  %v743_v3 = vpop.f32.mrb[31].mxu0  ;;  %v1024_v25 = vpop.f32.mrb[31].mxu1  ;;  %2538 = vmatmul.mubr.msk.f32.gmra.mrb[136].mxu0 %vm422_vm5, %v3657_v1  ;;  %2599 = vmatpush1.bf16.msra.mxu1 %v2598_v7 }
 0x195   :  { %v744_v13 = vadd.f32 %v743_v3, %v4649_v10  ;;  %v1025_v24 = vadd.f32 %v1024_v25, %v3631_v31  ;;  %1553 = vmatprep.mubr.f32.mxu0 %v4635_v8 }
 0x196   :  { %v1734_v15 = vmax.f32 %v742_v17, 0.0  ;;  %v1664_v29 = vmax.f32 %v1023_v34, 0.0 }
 0x197   :  { %v1735_v53 = vmax.f32 %v744_v13, 0.0  ;;  %v1665_v6 = vmax.f32 %v1025_v24, 0.0  ;;  %v747_v27 = vpop.f32.mrb[32].mxu0  ;;  %v1028_v22 = vpop.f32.mrb[32].mxu1 }
 0x198   :  { %v2602_v55 = vpack.c.bf16 %v1734_v15, %v1728_v19  ;;  %v4054_v11 = vpack.c.bf16 %v1664_v29, %v1658_v60  ;;  %v1029_v1 = vadd.f32 %v1028_v22, %v3644_v32  ;;  %v749_v7 = vpop.f32.mrb[33].mxu0  ;;  %v1030_v58 = vpop.f32.mrb[33].mxu1  ;;  %2539 = vmatmul.mubr.msk.f32.gmra.mrb[138].mxu0 %vm422_vm5, %v3672_v38  ;;  %v748_v21 = vadd.f32 %v747_v27, %v3730_v51 }
 0x199   :  { %v2600_v3 = vpack.c.bf16 %v1735_v53, %v1729_v54  ;;  %v4059_v25 = vpack.c.bf16 %v1665_v6, %v1659_v59  ;;  %v1031_v23 = vadd.f32 %v1030_v58, %v3644_v32  ;;  %1559 = vmatprep.mubr.f32.mxu0 %v4635_v8  ;;  %v750_v17 = vadd.f32 %v749_v7, %v3730_v51 }
 0x19a   :  { %4650 = vst [vmem:[#allocation45_spill] sm:$0xff] %v4054_v11  ;;  %v1670_v13 = vmax.f32 %v1029_v1, 0.0  ;;  %v1740_v53 = vmax.f32 %v748_v21, 0.0 }
 0x19b   :  { %v753_v60 = vpop.f32.mrb[34].mxu0  ;;  %v1034_v34 = vpop.f32.mrb[34].mxu1  ;;  %2601 = vmatprep.subr.bf16.mxu1 %v2600_v3  ;;  %v1671_v59 = vmax.f32 %v1031_v23, 0.0  ;;  %v1741_v22 = vmax.f32 %v750_v17, 0.0 }
 0x19c   :  { %v754_v24 = vadd.f32 %v753_v60, %v3738_v20  ;;  %v1035_v19 = vadd.f32 %v1034_v34, %v3646_v33  ;;  %v755_v38 = vpop.f32.mrb[35].mxu0  ;;  %v1036_v15 = vpop.f32.mrb[35].mxu1  ;;  %2540 = vmatmul.mubr.msk.f32.gmra.mrb[140].mxu0 %vm422_vm5, %v3687_v41  ;;  %2603 = vmatpush1.bf16.msra.mxu1 %v2602_v55 }
 0x19d   :  { %v756_v29 = vadd.f32 %v755_v38, %v3738_v20  ;;  %v1037_v54 = vadd.f32 %v1036_v15, %v3646_v33  ;;  %1565 = vmatprep.mubr.f32.mxu0 %v4635_v8 }
 0x19e   :  { %v1746_v6 = vmax.f32 %v754_v24, 0.0  ;;  %v1676_v27 = vmax.f32 %v1035_v19, 0.0 }
 0x19f   :  { %v1747_v1 = vmax.f32 %v756_v29, 0.0  ;;  %v1677_v7 = vmax.f32 %v1037_v54, 0.0  ;;  %v759_v58 = vpop.f32.mrb[36].mxu0  ;;  %v1040_v3 = vpop.f32.mrb[36].mxu1  ;;  %v4653_v54 = vld [vmem:[#allocation15_spill] sm:$0xff] }
 0x1a0   :  { %v2606_v60 = vpack.c.bf16 %v1746_v6, %v1740_v53  ;;  %v4072_v34 = vpack.c.bf16 %v1676_v27, %v1670_v13  ;;  %v1041_v41 = vadd.f32 %v1040_v3, %v3659_v36  ;;  %v761_v55 = vpop.f32.mrb[37].mxu0  ;;  %v1042_v23 = vpop.f32.mrb[37].mxu1  ;;  %2541 = vmatmul.mubr.msk.f32.gmra.mrb[142].mxu0 %vm422_vm5, %v3702_v46  ;;  %v760_v17 = vadd.f32 %v759_v58, %v3740_v47 }
 0x1a1   :  { %v2604_v38 = vpack.c.bf16 %v1747_v1, %v1741_v22  ;;  %v4077_v15 = vpack.c.bf16 %v1677_v7, %v1671_v59  ;;  %v1043_v21 = vadd.f32 %v1042_v23, %v3659_v36  ;;  %1571 = vmatprep.mubr.f32.mxu0 %v4635_v8  ;;  %v762_v24 = vadd.f32 %v761_v55, %v3740_v47  ;;  %v2909_v59 = vld [vmem:[%s4529_s1 + $0x120] sm:$0xff] }
 0x1a2   :  { %4651 = vst [vmem:[#allocation46_spill] sm:$0xff] %v4072_v34  ;;  %v1682_v29 = vmax.f32 %v1041_v41, 0.0  ;;  %v1752_v58 = vmax.f32 %v760_v17, 0.0 }
 0x1a3   :  { %4652 = vst [vmem:[#allocation47_spill] sm:$0xff] %v4077_v15  ;;  %v765_v13 = vpop.f32.mrb[38].mxu0  ;;  %v1046_v19 = vpop.f32.mrb[38].mxu1  ;;  %2605 = vmatprep.subr.bf16.mxu1 %v2604_v38  ;;  %v1683_v22 = vmax.f32 %v1043_v21, 0.0  ;;  %v1753_v55 = vmax.f32 %v762_v24, 0.0 }
 0x1a4   :  { %v766_v53 = vadd.f32 %v765_v13, %v4653_v54  ;;  %v1047_v6 = vadd.f32 %v1046_v19, %v3661_v37  ;;  %v767_v46 = vpop.f32.mrb[39].mxu0  ;;  %v1048_v27 = vpop.f32.mrb[39].mxu1  ;;  %2542 = vmatmul.mubr.msk.f32.gmra.mrb[144].mxu0 %vm422_vm5, %v2909_v59  ;;  %2607 = vmatpush1.bf16.msra.mxu1 %v2606_v60 }
 0x1a5   :  { %v768_v1 = vadd.f32 %v767_v46, %v4653_v54  ;;  %v1049_v7 = vadd.f32 %v1048_v27, %v3661_v37  ;;  %1577 = vmatprep.mubr.f32.mxu0 %v4635_v8  ;;  %v2910_v46 = vld [vmem:[%s4529_s1 + $0x128] sm:$0xff] }
 0x1a6   :  { %v1758_v3 = vmax.f32 %v766_v53, 0.0  ;;  %v1688_v41 = vmax.f32 %v1047_v6, 0.0 }
 0x1a7   :  { %v1759_v23 = vmax.f32 %v768_v1, 0.0  ;;  %v1689_v38 = vmax.f32 %v1049_v7, 0.0  ;;  %v771_v13 = vpop.f32.mrb[40].mxu0  ;;  %v1052_v19 = vpop.f32.mrb[40].mxu1 }
 0x1a8   :  { %v2610_v34 = vpack.c.bf16 %v1758_v3, %v1752_v58  ;;  %v4092_v15 = vpack.c.bf16 %v1688_v41, %v1682_v29  ;;  %v1053_v60 = vadd.f32 %v1052_v19, %v3674_v39  ;;  %v773_v21 = vpop.f32.mrb[41].mxu0  ;;  %v1054_v59 = vpop.f32.mrb[41].mxu1  ;;  %2543 = vmatmul.mubr.msk.f32.gmra.mrb[146].mxu0 %vm422_vm5, %v2910_v46  ;;  %v772_v29 = vadd.f32 %v771_v13, %v3756_v44 }
 0x1a9   :  { %v2608_v17 = vpack.c.bf16 %v1759_v23, %v1753_v55  ;;  %v4099_v53 = vpack.c.bf16 %v1689_v38, %v1683_v22  ;;  %v1055_v24 = vadd.f32 %v1054_v59, %v3674_v39  ;;  %1583 = vmatprep.mubr.f32.mxu0 %v4635_v8  ;;  %v774_v6 = vadd.f32 %v773_v21, %v3756_v44  ;;  %v2911_v22 = vld [vmem:[%s4529_s1 + $0x130] sm:$0xff] }
 0x1aa   :  { %4654 = vst [vmem:[#allocation48_spill] sm:$0xff] %v4092_v15  ;;  %v1694_v7 = vmax.f32 %v1053_v60, 0.0  ;;  %v1764_v19 = vmax.f32 %v772_v29, 0.0 }
 0x1ab   :  { %4655 = vst [vmem:[#allocation49_spill] sm:$0xff] %v4099_v53  ;;  %v777_v27 = vpop.f32.mrb[42].mxu0  ;;  %v1058_v1 = vpop.f32.mrb[42].mxu1  ;;  %2609 = vmatprep.subr.bf16.mxu1 %v2608_v17  ;;  %v1695_v23 = vmax.f32 %v1055_v24, 0.0  ;;  %v1765_v59 = vmax.f32 %v774_v6, 0.0 }
 0x1ac   :  { %v778_v58 = vadd.f32 %v777_v27, %v3764_v48  ;;  %v1059_v3 = vadd.f32 %v1058_v1, %v3676_v40  ;;  %v779_v41 = vpop.f32.mrb[43].mxu0  ;;  %v1060_v55 = vpop.f32.mrb[43].mxu1  ;;  %2544 = vmatmul.mubr.msk.f32.gmra.mrb[148].mxu0 %vm422_vm5, %v2911_v22  ;;  %2611 = vmatpush1.bf16.msra.mxu1 %v2610_v34 }
 0x1ad   :  { %v780_v38 = vadd.f32 %v779_v41, %v3764_v48  ;;  %v1061_v13 = vadd.f32 %v1060_v55, %v3676_v40  ;;  %1589 = vmatprep.mubr.f32.mxu0 %v4635_v8  ;;  %v2912_v41 = vld [vmem:[%s4529_s1 + $0x138] sm:$0xff] }
 0x1ae   :  { %v1770_v60 = vmax.f32 %v778_v58, 0.0  ;;  %v1700_v21 = vmax.f32 %v1059_v3, 0.0  ;;  %v4658_v3 = vld [vmem:[#allocation18_spill] sm:$0xff] }
 0x1af   :  { %v1771_v46 = vmax.f32 %v780_v38, 0.0  ;;  %v1701_v17 = vmax.f32 %v1061_v13, 0.0  ;;  %v783_v27 = vpop.f32.mrb[44].mxu0  ;;  %v1064_v1 = vpop.f32.mrb[44].mxu1 }
 0x1b0   :  { %v2614_v15 = vpack.c.bf16 %v1770_v60, %v1764_v19  ;;  %v4114_v53 = vpack.c.bf16 %v1700_v21, %v1694_v7  ;;  %v1065_v34 = vadd.f32 %v1064_v1, %v3689_v42  ;;  %v785_v24 = vpop.f32.mrb[45].mxu0  ;;  %v1066_v22 = vpop.f32.mrb[45].mxu1  ;;  %2545 = vmatmul.mubr.msk.f32.gmra.mrb[150].mxu0 %vm422_vm5, %v2912_v41  ;;  %v784_v7 = vadd.f32 %v783_v27, %v4658_v3  ;;  %v4659_v60 = vld [vmem:[#allocation19_spill] sm:$0xff] }
 0x1b1   :  { %v2612_v29 = vpack.c.bf16 %v1771_v46, %v1765_v59  ;;  %v4121_v58 = vpack.c.bf16 %v1701_v17, %v1695_v23  ;;  %v1067_v6 = vadd.f32 %v1066_v22, %v3689_v42  ;;  %1595 = vmatprep.mubr.f32.mxu0 %v4635_v8  ;;  %v786_v55 = vadd.f32 %v785_v24, %v4658_v3  ;;  %v2913_v23 = vld [vmem:[%s4529_s1 + $0x140] sm:$0xff] }
 0x1b2   :  { %4656 = vst [vmem:[#allocation50_spill] sm:$0xff] %v4114_v53  ;;  %v1706_v19 = vmax.f32 %v1065_v34, 0.0  ;;  %v1776_v34 = vmax.f32 %v784_v7, 0.0 }
 0x1b3   :  { %4657 = vst [vmem:[#allocation51_spill] sm:$0xff] %v4121_v58  ;;  %v789_v38 = vpop.f32.mrb[46].mxu0  ;;  %v1070_v13 = vpop.f32.mrb[46].mxu1  ;;  %2613 = vmatprep.subr.bf16.mxu1 %v2612_v29  ;;  %v1707_v46 = vmax.f32 %v1067_v6, 0.0  ;;  %v1777_v29 = vmax.f32 %v786_v55, 0.0 }
 0x1b4   :  { %v790_v21 = vadd.f32 %v789_v38, %v4659_v60  ;;  %v1071_v1 = vadd.f32 %v1070_v13, %v3691_v43  ;;  %v791_v41 = vpop.f32.mrb[47].mxu0  ;;  %v1072_v59 = vpop.f32.mrb[47].mxu1  ;;  %2546 = vmatmul.mubr.msk.f32.gmra.mrb[152].mxu0 %vm422_vm5, %v2913_v23  ;;  %2615 = vmatpush1.bf16.msra.mxu1 %v2614_v15 }
 0x1b5   :  { %v792_v17 = vadd.f32 %v791_v41, %v4659_v60  ;;  %v1073_v27 = vadd.f32 %v1072_v59, %v3691_v43  ;;  %1601 = vmatprep.mubr.f32.mxu0 %v4635_v8  ;;  %v2914_v41 = vld [vmem:[%s4529_s1 + $0x148] sm:$0xff] }
 0x1b6   :  { %v1782_v24 = vmax.f32 %v790_v21, 0.0  ;;  %v1712_v22 = vmax.f32 %v1071_v1, 0.0  ;;  %v4662_v1 = vld [vmem:[#allocation20_spill] sm:$0xff] }
 0x1b7   :  { %v1783_v38 = vmax.f32 %v792_v17, 0.0  ;;  %v1713_v13 = vmax.f32 %v1073_v27, 0.0  ;;  %v795_v53 = vpop.f32.mrb[48].mxu0  ;;  %v1076_v58 = vpop.f32.mrb[48].mxu1 }
 0x1b8   :  { %v2618_v42 = vpack.c.bf16 %v1782_v24, %v1776_v34  ;;  %v4136_v11 = vpack.c.bf16 %v1712_v22, %v1706_v19  ;;  %v1077_v15 = vadd.f32 %v1076_v58, %v4647_v14  ;;  %v797_v6 = vpop.f32.mrb[49].mxu0  ;;  %v1078_v23 = vpop.f32.mrb[49].mxu1  ;;  %2547 = vmatmul.mubr.msk.f32.gmra.mrb[154].mxu0 %vm422_vm5, %v2914_v41  ;;  %v796_v19 = vadd.f32 %v795_v53, %v4662_v1  ;;  %v4663_v34 = vld [vmem:[#allocation21_spill] sm:$0xff] }
 0x1b9   :  { %v2616_v7 = vpack.c.bf16 %v1783_v38, %v1777_v29  ;;  %v4143_v21 = vpack.c.bf16 %v1713_v13, %v1707_v46  ;;  %v1079_v55 = vadd.f32 %v1078_v23, %v4647_v14  ;;  %1607 = vmatprep.mubr.f32.mxu0 %v4635_v8  ;;  %v798_v59 = vadd.f32 %v797_v6, %v4662_v1  ;;  %v2915_v46 = vld [vmem:[%s4529_s1 + $0x150] sm:$0xff] }
 0x1ba   :  { %4660 = vst [vmem:[#allocation19_spill] sm:$0xff] %v4136_v11  ;;  %v1718_v27 = vmax.f32 %v1077_v15, 0.0  ;;  %v1788_v15 = vmax.f32 %v796_v19, 0.0 }
 0x1bb   :  { %4661 = vst [vmem:[#allocation52_spill] sm:$0xff] %v4143_v21  ;;  %v801_v58 = vpop.f32.mrb[50].mxu0  ;;  %v1082_v17 = vpop.f32.mrb[50].mxu1  ;;  %2617 = vmatprep.subr.bf16.mxu1 %v2616_v7  ;;  %v1719_v53 = vmax.f32 %v1079_v55, 0.0  ;;  %v1789_v7 = vmax.f32 %v798_v59, 0.0 }
 0x1bc   :  { %v802_v24 = vadd.f32 %v801_v58, %v4663_v34  ;;  %v1083_v22 = vadd.f32 %v1082_v17, %v3712_v50  ;;  %v803_v41 = vpop.f32.mrb[51].mxu0  ;;  %v1084_v29 = vpop.f32.mrb[51].mxu1  ;;  %2548 = vmatmul.mubr.msk.f32.gmra.mrb[156].mxu0 %vm422_vm5, %v2915_v46  ;;  %2619 = vmatpush1.bf16.msra.mxu1 %v2618_v42 }
 0x1bd   :  { %v804_v38 = vadd.f32 %v803_v41, %v4663_v34  ;;  %v1085_v13 = vadd.f32 %v1084_v29, %v3712_v50  ;;  %1613 = vmatprep.mubr.f32.mxu0 %v4635_v8  ;;  %v2916_v41 = vld [vmem:[%s4529_s1 + $0x158] sm:$0xff] }
 0x1be   :  { %v1794_v6 = vmax.f32 %v802_v24, 0.0  ;;  %v1724_v23 = vmax.f32 %v1083_v22, 0.0  ;;  %v4666_v22 = vld [vmem:[#allocation22_spill] sm:$0xff] }
 0x1bf   :  { %v1795_v58 = vmax.f32 %v804_v38, 0.0  ;;  %v1725_v17 = vmax.f32 %v1085_v13, 0.0  ;;  %v807_v11 = vpop.f32.mrb[52].mxu0  ;;  %v1088_v14 = vpop.f32.mrb[52].mxu1 }
 0x1c0   :  { %v2622_v21 = vpack.c.bf16 %v1794_v6, %v1788_v15  ;;  %v4158_v43 = vpack.c.bf16 %v1724_v23, %v1718_v27  ;;  %v1089_v42 = vadd.f32 %v1088_v14, %v4648_v49  ;;  %v809_v55 = vpop.f32.mrb[53].mxu0  ;;  %v1090_v46 = vpop.f32.mrb[53].mxu1  ;;  %2549 = vmatmul.mubr.msk.f32.gmra.mrb[158].mxu0 %vm422_vm5, %v2916_v41  ;;  %v808_v27 = vadd.f32 %v807_v11, %v4666_v22  ;;  %v4667_v15 = vld [vmem:[#allocation23_spill] sm:$0xff] }
 0x1c1   :  { %v2620_v19 = vpack.c.bf16 %v1795_v58, %v1789_v7  ;;  %v4165_v24 = vpack.c.bf16 %v1725_v17, %v1719_v53  ;;  %v1091_v59 = vadd.f32 %v1090_v46, %v4648_v49  ;;  %1619 = vmatprep.mubr.f32.mxu0 %v4635_v8  ;;  %v810_v29 = vadd.f32 %v809_v55, %v4666_v22  ;;  %v2917_v53 = vld [vmem:[%s4529_s1 + $0x160] sm:$0xff] }
 0x1c2   :  { %4664 = vst [vmem:[#allocation20_spill] sm:$0xff] %v4158_v43  ;;  %v1730_v13 = vmax.f32 %v1089_v42, 0.0  ;;  %v1800_v42 = vmax.f32 %v808_v27, 0.0 }
 0x1c3   :  { %4665 = vst [vmem:[#allocation21_spill] sm:$0xff] %v4165_v24  ;;  %v813_v14 = vpop.f32.mrb[54].mxu0  ;;  %v1094_v38 = vpop.f32.mrb[54].mxu1  ;;  %2621 = vmatprep.subr.bf16.mxu1 %v2620_v19  ;;  %v1731_v11 = vmax.f32 %v1091_v59, 0.0  ;;  %v1801_v19 = vmax.f32 %v810_v29, 0.0 }
 0x1c4   :  { %v814_v6 = vadd.f32 %v813_v14, %v4667_v15  ;;  %v1095_v23 = vadd.f32 %v1094_v38, %v4649_v10  ;;  %v815_v41 = vpop.f32.mrb[55].mxu0  ;;  %v1096_v7 = vpop.f32.mrb[55].mxu1  ;;  %2550 = vmatmul.mubr.msk.f32.gmra.mrb[160].mxu0 %vm422_vm5, %v2917_v53  ;;  %2623 = vmatpush1.bf16.msra.mxu1 %v2622_v21 }
 0x1c5   :  { %v816_v58 = vadd.f32 %v815_v41, %v4667_v15  ;;  %v1097_v17 = vadd.f32 %v1096_v7, %v4649_v10  ;;  %1625 = vmatprep.mubr.f32.mxu0 %v4635_v8  ;;  %v2918_v41 = vld [vmem:[%s4529_s1 + $0x168] sm:$0xff] }
 0x1c6   :  { %v1806_v55 = vmax.f32 %v814_v6, 0.0  ;;  %v1736_v46 = vmax.f32 %v1095_v23, 0.0  ;;  %v4670_v23 = vld [vmem:[#allocation24_spill] sm:$0xff] }
 0x1c7   :  { %v1807_v14 = vmax.f32 %v816_v58, 0.0  ;;  %v1737_v38 = vmax.f32 %v1097_v17, 0.0  ;;  %v819_v49 = vpop.f32.mrb[56].mxu0  ;;  %v1100_v43 = vpop.f32.mrb[56].mxu1 }
 0x1c8   :  { %v2626_v24 = vpack.c.bf16 %v1806_v55, %v1800_v42  ;;  %v4180_v50 = vpack.c.bf16 %v1736_v46, %v1730_v13  ;;  %v1101_v21 = vadd.f32 %v1100_v43, %v3730_v51  ;;  %v821_v59 = vpop.f32.mrb[57].mxu0  ;;  %v1102_v53 = vpop.f32.mrb[57].mxu1  ;;  %2551 = vmatmul.mubr.msk.f32.gmra.mrb[162].mxu0 %vm422_vm5, %v2918_v41  ;;  %v820_v13 = vadd.f32 %v819_v49, %v4670_v23  ;;  %v4671_v42 = vld [vmem:[#allocation25_spill] sm:$0xff] }
 0x1c9   :  { %v2624_v27 = vpack.c.bf16 %v1807_v14, %v1801_v19  ;;  %v4187_v6 = vpack.c.bf16 %v1737_v38, %v1731_v11  ;;  %v1103_v29 = vadd.f32 %v1102_v53, %v3730_v51  ;;  %1631 = vmatprep.mubr.f32.mxu0 %v4635_v8  ;;  %v822_v7 = vadd.f32 %v821_v59, %v4670_v23  ;;  %v2919_v11 = vld [vmem:[%s4529_s1 + $0x170] sm:$0xff] }
 0x1ca   :  { %4668 = vst [vmem:[#allocation22_spill] sm:$0xff] %v4180_v50  ;;  %v1742_v17 = vmax.f32 %v1101_v21, 0.0  ;;  %v1812_v21 = vmax.f32 %v820_v13, 0.0 }
 0x1cb   :  { %4669 = vst [vmem:[#allocation23_spill] sm:$0xff] %v4187_v6  ;;  %v825_v43 = vpop.f32.mrb[58].mxu0  ;;  %v1106_v58 = vpop.f32.mrb[58].mxu1  ;;  %2625 = vmatprep.subr.bf16.mxu1 %v2624_v27  ;;  %v1743_v49 = vmax.f32 %v1103_v29, 0.0  ;;  %v1813_v27 = vmax.f32 %v822_v7, 0.0 }
 0x1cc   :  { %v826_v55 = vadd.f32 %v825_v43, %v4671_v42  ;;  %v1107_v46 = vadd.f32 %v1106_v58, %v3738_v20  ;;  %v827_v41 = vpop.f32.mrb[59].mxu0  ;;  %v1108_v19 = vpop.f32.mrb[59].mxu1  ;;  %2552 = vmatmul.mubr.msk.f32.gmra.mrb[164].mxu0 %vm422_vm5, %v2919_v11  ;;  %2627 = vmatpush1.bf16.msra.mxu1 %v2626_v24 }
 0x1cd   :  { %v828_v14 = vadd.f32 %v827_v41, %v4671_v42  ;;  %v1109_v38 = vadd.f32 %v1108_v19, %v3738_v20  ;;  %1637 = vmatprep.mubr.f32.mxu0 %v4635_v8  ;;  %v2920_v41 = vld [vmem:[%s4529_s1 + $0x178] sm:$0xff] }
 0x1ce   :  { %v1818_v59 = vmax.f32 %v826_v55, 0.0  ;;  %v1748_v53 = vmax.f32 %v1107_v46, 0.0  ;;  %v4674_v46 = vld [vmem:[#allocation26_spill] sm:$0xff] }
 0x1cf   :  { %v1819_v43 = vmax.f32 %v828_v14, 0.0  ;;  %v1749_v58 = vmax.f32 %v1109_v38, 0.0  ;;  %v831_v51 = vpop.f32.mrb[60].mxu0  ;;  %v1112_v50 = vpop.f32.mrb[60].mxu1 }
 0x1d0   :  { %v2630_v10 = vpack.c.bf16 %v1818_v59, %v1812_v21  ;;  %v4202_v6 = vpack.c.bf16 %v1748_v53, %v1742_v17  ;;  %v1113_v24 = vadd.f32 %v1112_v50, %v3740_v47  ;;  %v833_v29 = vpop.f32.mrb[61].mxu0  ;;  %v1114_v11 = vpop.f32.mrb[61].mxu1  ;;  %2553 = vmatmul.mubr.msk.f32.gmra.mrb[166].mxu0 %vm422_vm5, %v2920_v41  ;;  %v832_v17 = vadd.f32 %v831_v51, %v4674_v46  ;;  %v4675_v21 = vld [vmem:[#allocation27_spill] sm:$0xff] }
 0x1d1   :  { %v2628_v13 = vpack.c.bf16 %v1819_v43, %v1813_v27  ;;  %v4209_v55 = vpack.c.bf16 %v1749_v58, %v1743_v49  ;;  %v1115_v7 = vadd.f32 %v1114_v11, %v3740_v47  ;;  %2291 = vmatprep.mubr.f32.mxu0 %v3945_v2  ;;  %v834_v19 = vadd.f32 %v833_v29, %v4674_v46 }
 0x1d2   :  { %4672 = vst [vmem:[#allocation24_spill] sm:$0xff] %v4202_v6  ;;  %v1754_v38 = vmax.f32 %v1113_v24, 0.0  ;;  %v1824_v11 = vmax.f32 %v832_v17, 0.0  ;;  %v4676_v17 = vld [vmem:[#allocation28_spill] sm:$0xff] }
 0x1d3   :  { %4673 = vst [vmem:[#allocation25_spill] sm:$0xff] %v4209_v55  ;;  %v837_v50 = vpop.f32.mrb[62].mxu0  ;;  %v1118_v14 = vpop.f32.mrb[62].mxu1  ;;  %2629 = vmatprep.subr.bf16.mxu1 %v2628_v13  ;;  %v1755_v49 = vmax.f32 %v1115_v7, 0.0  ;;  %v1825_v29 = vmax.f32 %v834_v19, 0.0 }
 0x1d4   :  { %v838_v59 = vadd.f32 %v837_v50, %v4675_v21  ;;  %v1119_v53 = vadd.f32 %v1118_v14, %v4653_v54  ;;  %v839_v41 = vpop.f32.mrb[63].mxu0  ;;  %v1120_v27 = vpop.f32.mrb[63].mxu1  ;;  %2631 = vmatpush1.bf16.msra.mxu1 %v2630_v10 }
 0x1d5   :  { %v840_v43 = vadd.f32 %v839_v41, %v4675_v21  ;;  %v1121_v58 = vadd.f32 %v1120_v27, %v4653_v54 }
 0x1d6   :  { %v1830_v51 = vmax.f32 %v838_v59, 0.0  ;;  %v1760_v47 = vmax.f32 %v1119_v53, 0.0 }
 0x1d7   :  { %v1831_v20 = vmax.f32 %v840_v43, 0.0  ;;  %v1761_v6 = vmax.f32 %v1121_v58, 0.0  ;;  %v843_v13 = vpop.f32.mrb[64].mxu0  ;;  %v1124_v24 = vpop.f32.mrb[64].mxu1  ;;  %v4677_v58 = vld [vmem:[#allocation29_spill] sm:$0xff] }
 0x1d8   :  { %v2634_v55 = vpack.c.bf16 %v1830_v51, %v1824_v11  ;;  %v4219_v50 = vpack.c.bf16 %v1760_v47, %v1754_v38  ;;  %v1125_v14 = vadd.f32 %v1124_v24, %v3756_v44  ;;  %v845_v40 = vpop.f32.mrb[65].mxu0  ;;  %v1126_v10 = vpop.f32.mrb[65].mxu1  ;;  %v844_v59 = vadd.f32 %v843_v13, %v4676_v17 }
 0x1d9   :  { %v2632_v7 = vpack.c.bf16 %v1831_v20, %v1825_v29  ;;  %v4222_v2 = vpack.c.bf16 %v1761_v6, %v1755_v49  ;;  %v1127_v41 = vadd.f32 %v1126_v10, %v3756_v44  ;;  %v846_v19 = vadd.f32 %v845_v40, %v4676_v17 }
 0x1da   :  { %v1766_v43 = vmax.f32 %v1125_v14, 0.0  ;;  %v1836_v29 = vmax.f32 %v844_v59, 0.0 }
 0x1db   :  { %v849_v53 = vpop.f32.mrb[66].mxu0  ;;  %v1130_v27 = vpop.f32.mrb[66].mxu1  ;;  %2633 = vmatprep.subr.bf16.mxu1 %v2632_v7  ;;  %v1767_v20 = vmax.f32 %v1127_v41, 0.0  ;;  %v1837_v40 = vmax.f32 %v846_v19, 0.0 }
 0x1dc   :  { %v850_v47 = vadd.f32 %v849_v53, %v4677_v58  ;;  %v1131_v38 = vadd.f32 %v1130_v27, %v3764_v48  ;;  %v851_v11 = vpop.f32.mrb[67].mxu0  ;;  %v1132_v51 = vpop.f32.mrb[67].mxu1  ;;  %2635 = vmatpush1.bf16.msra.mxu1 %v2634_v55 }
 0x1dd   :  { %v852_v6 = vadd.f32 %v851_v11, %v4677_v58  ;;  %v1133_v49 = vadd.f32 %v1132_v51, %v3764_v48 }
 0x1de   :  { %v1842_v13 = vmax.f32 %v850_v47, 0.0  ;;  %v1772_v24 = vmax.f32 %v1131_v38, 0.0  ;;  %v4680_v47 = vld [vmem:[#allocation30_spill] sm:$0xff] }
 0x1df   :  { %v1843_v10 = vmax.f32 %v852_v6, 0.0  ;;  %v1773_v44 = vmax.f32 %v1133_v49, 0.0  ;;  %v855_v7 = vpop.f32.mrb[68].mxu0  ;;  %v1136_v14 = vpop.f32.mrb[68].mxu1  ;;  %2008 = vmatmul.mubr.f32.vlgmr.msra.gmra.mrb[120].mxu1 %v3930_v63  ;;  %v4681_v49 = vld [vmem:[#allocation31_spill] sm:$0xff] }
 0x1e0   :  { %v2638_v53 = vpack.c.bf16 %v1842_v13, %v1836_v29  ;;  %v4232_v27 = vpack.c.bf16 %v1772_v24, %v1766_v43  ;;  %v1137_v55 = vadd.f32 %v1136_v14, %v4658_v3  ;;  %v857_v41 = vpop.f32.mrb[69].mxu0  ;;  %v1138_v54 = vpop.f32.mrb[69].mxu1  ;;  %2078 = vmatprep.mubr.f32.mxu1 %v4635_v8  ;;  %v856_v38 = vadd.f32 %v855_v7, %v4680_v47 }
 0x1e1   :  { %v2636_v11 = vpack.c.bf16 %v1843_v10, %v1837_v40  ;;  %v4236_v59 = vpack.c.bf16 %v1773_v44, %v1767_v20  ;;  %v1139_v19 = vadd.f32 %v1138_v54, %v4658_v3  ;;  %v858_v51 = vadd.f32 %v857_v41, %v4680_v47 }
 0x1e2   :  { %4678 = vst [vmem:[#allocation26_spill] sm:$0xff] %v4232_v27  ;;  %v1778_v43 = vmax.f32 %v1137_v55, 0.0  ;;  %v1848_v20 = vmax.f32 %v856_v38, 0.0 }
 0x1e3   :  { %4679 = vst [vmem:[#allocation27_spill] sm:$0xff] %v4236_v59  ;;  %v861_v6 = vpop.f32.mrb[70].mxu0  ;;  %v1142_v63 = vpop.f32.mrb[70].mxu1  ;;  %2637 = vmatprep.subr.bf16.mxu1 %v2636_v11  ;;  %v1779_v40 = vmax.f32 %v1139_v19, 0.0  ;;  %v1849_v41 = vmax.f32 %v858_v51, 0.0 }
 0x1e4   :  { %v862_v29 = vadd.f32 %v861_v6, %v4681_v49  ;;  %v1143_v13 = vadd.f32 %v1142_v63, %v4659_v60  ;;  %v863_v24 = vpop.f32.mrb[71].mxu0  ;;  %v1144_v14 = vpop.f32.mrb[71].mxu1  ;;  %2639 = vmatpush1.bf16.msra.mxu1 %v2638_v53 }
 0x1e5   :  { %v864_v44 = vadd.f32 %v863_v24, %v4681_v49  ;;  %v1145_v54 = vadd.f32 %v1144_v14, %v4659_v60 }
 0x1e6   :  { %v1854_v10 = vmax.f32 %v862_v29, 0.0  ;;  %v1784_v7 = vmax.f32 %v1143_v13, 0.0 }
 0x1e7   :  { %v1855_v8 = vmax.f32 %v864_v44, 0.0  ;;  %v1785_v3 = vmax.f32 %v1145_v54, 0.0  ;;  %v1148_v11 = vpop.f32.mrb[72].mxu1  ;;  %v1357_v55 = vpop.f32.mrb[72].mxu0 }
 0x1e8   :  { %v2642_v48 = vpack.c.bf16 %v1854_v10, %v1848_v20  ;;  %v4245_v6 = vpack.c.bf16 %v1784_v7, %v1778_v43  ;;  %v1150_v63 = vpop.f32.mrb[73].mxu1  ;;  %v1359_v27 = vpop.f32.mrb[73].mxu0  ;;  %v1149_v19 = vadd.f32 %v1148_v11, %v4662_v1  ;;  %v1358_v24 = vadd.f32 %v1357_v55, %v3616_v28 }
 0x1e9   :  { %v2640_v59 = vpack.c.bf16 %v1855_v8, %v1849_v41  ;;  %v4247_v53 = vpack.c.bf16 %v1785_v3, %v1779_v40  ;;  %v1151_v38 = vadd.f32 %v1150_v63, %v4662_v1  ;;  %v1360_v51 = vadd.f32 %v1359_v27, %v3616_v28 }
 0x1ea   :  { %v1790_v40 = vmax.f32 %v1149_v19, 0.0  ;;  %v1648_v20 = vmax.f32 %v1358_v24, 0.0 }
 0x1eb   :  { %v1154_v29 = vpop.f32.mrb[74].mxu1  ;;  %v1363_v13 = vpop.f32.mrb[74].mxu0  ;;  %2641 = vmatprep.subr.bf16.mxu1 %v2640_v59  ;;  %v1791_v27 = vmax.f32 %v1151_v38, 0.0  ;;  %v1649_v7 = vmax.f32 %v1360_v51, 0.0 }
 0x1ec   :  { %v1155_v14 = vadd.f32 %v1154_v29, %v4663_v34  ;;  %v1364_v43 = vadd.f32 %v1363_v13, %v3603_v26  ;;  %v1156_v44 = vpop.f32.mrb[75].mxu1  ;;  %v1365_v54 = vpop.f32.mrb[75].mxu0  ;;  %2643 = vmatpush1.bf16.msra.mxu1 %v2642_v48 }
 0x1ed   :  { %v1157_v8 = vadd.f32 %v1156_v44, %v4663_v34  ;;  %v1366_v3 = vadd.f32 %v1365_v54, %v3603_v26  ;;  %2645 = vmatprep.subr.bf16.mxu1 %v3896_v35 }
 0x1ee   :  { %v1796_v10 = vmax.f32 %v1155_v14, 0.0  ;;  %v1654_v28 = vmax.f32 %v1364_v43, 0.0 }
 0x1ef   :  { %v1797_v59 = vmax.f32 %v1157_v8, 0.0  ;;  %v1655_v41 = vmax.f32 %v1366_v3, 0.0  ;;  %v1160_v11 = vpop.f32.mrb[76].mxu1  ;;  %v1369_v55 = vpop.f32.mrb[76].mxu0 }
 0x1f0   :  { %v4258_v63 = vpack.c.bf16 %v1796_v10, %v1790_v40  ;;  %v2766_v29 = vpack.c.bf16 %v1654_v28, %v1648_v20  ;;  %v1162_v48 = vpop.f32.mrb[77].mxu1  ;;  %v1371_v13 = vpop.f32.mrb[77].mxu0  ;;  %2647 = vmatpush1.bf16.msra.mxu1 %v3890_v45  ;;  %v1161_v19 = vadd.f32 %v1160_v11, %v4666_v22  ;;  %v1370_v24 = vadd.f32 %v1369_v55, %v3629_v30 }
 0x1f1   :  { %v4261_v26 = vpack.c.bf16 %v1797_v59, %v1791_v27  ;;  %v2764_v35 = vpack.c.bf16 %v1655_v41, %v1649_v7  ;;  %2649 = vmatprep.subr.bf16.mxu1 %v3924_v52  ;;  %v1163_v38 = vadd.f32 %v1162_v48, %v4666_v22  ;;  %v1372_v51 = vadd.f32 %v1371_v13, %v3629_v30 }
 0x1f2   :  { %v1802_v40 = vmax.f32 %v1161_v19, 0.0  ;;  %v1660_v30 = vmax.f32 %v1370_v24, 0.0 }
 0x1f3   :  { %v1166_v14 = vpop.f32.mrb[78].mxu1  ;;  %v1375_v43 = vpop.f32.mrb[78].mxu0  ;;  %2765 = vmatprep.subr.bf16.mxu0 %v2764_v35  ;;  %v1803_v28 = vmax.f32 %v1163_v38, 0.0  ;;  %v1661_v27 = vmax.f32 %v1372_v51, 0.0 }
 0x1f4   :  { %v1167_v44 = vadd.f32 %v1166_v14, %v4667_v15  ;;  %v1376_v45 = vadd.f32 %v1375_v43, %v3631_v31  ;;  %v1168_v54 = vpop.f32.mrb[79].mxu1  ;;  %v1377_v8 = vpop.f32.mrb[79].mxu0  ;;  %2651 = vmatpush1.bf16.msra.mxu1 %v3918_v62  ;;  %2767 = vmatpush1.bf16.msra.mxu0 %v2766_v29 }
 0x1f5   :  { %v1169_v52 = vadd.f32 %v1168_v54, %v4667_v15  ;;  %v1378_v3 = vadd.f32 %v1377_v8, %v3631_v31  ;;  %2653 = vmatprep.subr.bf16.mxu1 %v3961_v9 }
 0x1f6   :  { %v1808_v20 = vmax.f32 %v1167_v44, 0.0  ;;  %v1666_v10 = vmax.f32 %v1376_v45, 0.0 }
 0x1f7   :  { %v1809_v7 = vmax.f32 %v1169_v52, 0.0  ;;  %v1667_v59 = vmax.f32 %v1378_v3, 0.0  ;;  %v1172_v41 = vpop.f32.mrb[80].mxu1  ;;  %v1381_v11 = vpop.f32.mrb[80].mxu0 }
 0x1f8   :  { %v4274_v55 = vpack.c.bf16 %v1808_v20, %v1802_v40  ;;  %v2770_v62 = vpack.c.bf16 %v1666_v10, %v1660_v30  ;;  %v1174_v29 = vpop.f32.mrb[81].mxu1  ;;  %v1383_v48 = vpop.f32.mrb[81].mxu0  ;;  %2655 = vmatpush1.bf16.msra.mxu1 %v3955_v16  ;;  %v1173_v13 = vadd.f32 %v1172_v41, %v4670_v23  ;;  %v1382_v35 = vadd.f32 %v1381_v11, %v3644_v32 }
 0x1f9   :  { %v4277_v31 = vpack.c.bf16 %v1809_v7, %v1803_v28  ;;  %v2768_v9 = vpack.c.bf16 %v1667_v59, %v1661_v27  ;;  %2657 = vmatprep.subr.bf16.mxu1 %v3984_v12  ;;  %v1175_v19 = vadd.f32 %v1174_v29, %v4670_v23  ;;  %v1384_v24 = vadd.f32 %v1383_v48, %v3644_v32 }
 0x1fa   :  { %v1814_v54 = vmax.f32 %v1173_v13, 0.0  ;;  %v1672_v32 = vmax.f32 %v1382_v35, 0.0 }
 0x1fb   :  { %v1178_v38 = vpop.f32.mrb[82].mxu1  ;;  %v1387_v51 = vpop.f32.mrb[82].mxu0  ;;  %2769 = vmatprep.subr.bf16.mxu0 %v2768_v9  ;;  %v1815_v3 = vmax.f32 %v1175_v19, 0.0  ;;  %v1673_v40 = vmax.f32 %v1384_v24, 0.0 }
 0x1fc   :  { %v1179_v14 = vadd.f32 %v1178_v38, %v4671_v42  ;;  %v1388_v16 = vadd.f32 %v1387_v51, %v3646_v33  ;;  %v1180_v43 = vpop.f32.mrb[83].mxu1  ;;  %v1389_v44 = vpop.f32.mrb[83].mxu0  ;;  %2659 = vmatpush1.bf16.msra.mxu1 %v3978_v0  ;;  %2771 = vmatpush1.bf16.msra.mxu0 %v2770_v62 }
 0x1fd   :  { %v1181_v12 = vadd.f32 %v1180_v43, %v4671_v42  ;;  %v1390_v45 = vadd.f32 %v1389_v44, %v3646_v33  ;;  %2661 = vmatprep.subr.bf16.mxu1 %v4006_v4 }
 0x1fe   :  { %v1820_v8 = vmax.f32 %v1179_v14, 0.0  ;;  %v1678_v52 = vmax.f32 %v1388_v16, 0.0 }
 0x1ff   :  { %v1821_v30 = vmax.f32 %v1181_v12, 0.0  ;;  %v1679_v20 = vmax.f32 %v1390_v45, 0.0  ;;  %v1184_v10 = vpop.f32.mrb[84].mxu1  ;;  %v1393_v28 = vpop.f32.mrb[84].mxu0 }
 0x200   :  { %v4290_v27 = vpack.c.bf16 %v1820_v8, %v1814_v54  ;;  %v2774_v0 = vpack.c.bf16 %v1678_v52, %v1672_v32  ;;  %v1186_v7 = vpop.f32.mrb[85].mxu1  ;;  %v1395_v59 = vpop.f32.mrb[85].mxu0  ;;  %2663 = vmatpush1.bf16.msra.mxu1 %v4000_v61  ;;  %v1185_v41 = vadd.f32 %v1184_v10, %v4674_v46  ;;  %v1394_v11 = vadd.f32 %v1393_v28, %v3659_v36 }
 0x201   :  { %v4293_v33 = vpack.c.bf16 %v1821_v30, %v1815_v3  ;;  %v2772_v4 = vpack.c.bf16 %v1679_v20, %v1673_v40  ;;  %2665 = vmatprep.subr.bf16.mxu1 %v4025_v5  ;;  %v1187_v62 = vadd.f32 %v1186_v7, %v4674_v46  ;;  %v1396_v29 = vadd.f32 %v1395_v59, %v3659_v36  ;;  %v4306_v5 = vld [vmem:[%s4531_s3 + $0x8] sm:$0x7]  ;;  %v4682_v20 = vld [vmem:[#allocation38_spill] sm:$0xff]  ;;  %v4683_v59 = vld [vmem:[#allocation5_spill] sm:$0xff] }
 0x202   :  { %v1826_v38 = vmax.f32 %v1185_v41, 0.0  ;;  %v1684_v51 = vmax.f32 %v1394_v11, 0.0 }
 0x203   :  { %v1190_v48 = vpop.f32.mrb[86].mxu1  ;;  %v1399_v9 = vpop.f32.mrb[86].mxu0  ;;  %2773 = vmatprep.subr.bf16.mxu0 %v2772_v4  ;;  %v1827_v43 = vmax.f32 %v1187_v62, 0.0  ;;  %v1685_v44 = vmax.f32 %v1396_v29, 0.0 }
 0x204   :  { %v1191_v13 = vadd.f32 %v1190_v48, %v4675_v21  ;;  %v1400_v61 = vadd.f32 %v1399_v9, %v3661_v37  ;;  %v1192_v35 = vpop.f32.mrb[87].mxu1  ;;  %v1401_v19 = vpop.f32.mrb[87].mxu0  ;;  %2667 = vmatpush1.bf16.msra.mxu1 %v4021_v57  ;;  %2775 = vmatpush1.bf16.msra.mxu0 %v2774_v0  ;;  %v4685_v48 = vld [vmem:[#allocation47_spill] sm:$0xff] }
 0x205   :  { %v1193_v24 = vadd.f32 %v1192_v35, %v4675_v21  ;;  %v1402_v36 = vadd.f32 %v1401_v19, %v3661_v37  ;;  %2669 = vmatprep.subr.bf16.mxu1 %v4041_v56 }
 0x206   :  { %v1832_v14 = vmax.f32 %v1191_v13, 0.0  ;;  %v1690_v16 = vmax.f32 %v1400_v61, 0.0 }
 0x207   :  { %v1833_v12 = vmax.f32 %v1193_v24, 0.0  ;;  %v1691_v57 = vmax.f32 %v1402_v36, 0.0  ;;  %v1196_v45 = vpop.f32.mrb[88].mxu1  ;;  %v1405_v54 = vpop.f32.mrb[88].mxu0  ;;  %2079 = vmatmul.mubr.f32.vlgmr.msra.gmra.mrb[120].mxu1 %v4306_v5 }
 0x208   :  { %v4312_v32 = vpack.c.bf16 %v1832_v14, %v1826_v38  ;;  %v2778_v8 = vpack.c.bf16 %v1690_v16, %v1684_v51  ;;  %v1198_v52 = vpop.f32.mrb[89].mxu1  ;;  %v1407_v3 = vpop.f32.mrb[89].mxu0  ;;  %2671 = vmatpush1.bf16.msra.mxu1 %v4036_v18  ;;  %v1197_v40 = vadd.f32 %v1196_v45, %v4676_v17  ;;  %v1406_v30 = vadd.f32 %v1405_v54, %v3674_v39  ;;  %v4687_v54 = vld [vmem:[#allocation49_spill] sm:$0xff] }
 0x209   :  { %v4315_v37 = vpack.c.bf16 %v1833_v12, %v1827_v43  ;;  %v2776_v56 = vpack.c.bf16 %v1691_v57, %v1685_v44  ;;  %2673 = vmatprep.subr.bf16.mxu1 %v4059_v25  ;;  %2149 = vmatprep.mubr.f32.mxu1 %v4682_v20  ;;  %v1199_v10 = vadd.f32 %v1198_v52, %v4676_v17  ;;  %v4684_v25 = vld [vmem:[#allocation45_spill] sm:$0xff]  ;;  %v4686_v12 = vld [vmem:[#allocation46_spill] sm:$0xff] }
 0x20a   :  { %v1408_v28 = vadd.f32 %v1407_v3, %v3674_v39  ;;  %v1838_v9 = vmax.f32 %v1197_v40, 0.0  ;;  %v1696_v39 = vmax.f32 %v1406_v30, 0.0  ;;  %v4688_v52 = vld [vmem:[#allocation6_spill] sm:$0xff] }
 0x20b   :  { %v1202_v0 = vpop.f32.mrb[90].mxu1  ;;  %v1411_v7 = vpop.f32.mrb[90].mxu0  ;;  %2777 = vmatprep.subr.bf16.mxu0 %v2776_v56  ;;  %v1839_v35 = vmax.f32 %v1199_v10, 0.0 }
 0x20c   :  { %v1203_v18 = vadd.f32 %v1202_v0, %v4677_v58  ;;  %v1412_v4 = vadd.f32 %v1411_v7, %v4683_v59  ;;  %v1204_v41 = vpop.f32.mrb[91].mxu1  ;;  %v1413_v11 = vpop.f32.mrb[91].mxu0  ;;  %2675 = vmatpush1.bf16.msra.mxu1 %v4684_v25  ;;  %2779 = vmatpush1.bf16.msra.mxu0 %v2778_v8  ;;  %v1697_v19 = vmax.f32 %v1408_v28, 0.0  ;;  %v4689_v28 = vld [vmem:[#allocation7_spill] sm:$0xff] }
 0x20d   :  { %v1205_v62 = vadd.f32 %v1204_v41, %v4677_v58  ;;  %v1414_v29 = vadd.f32 %v1413_v11, %v4683_v59  ;;  %2677 = vmatprep.subr.bf16.mxu1 %v4685_v48  ;;  %v4690_v59 = vld [vmem:[#allocation48_spill] sm:$0xff]  ;;  %v4691_v11 = vld [vmem:[#allocation51_spill] sm:$0xff] }
 0x20e   :  { %v1844_v13 = vmax.f32 %v1203_v18, 0.0  ;;  %v1702_v61 = vmax.f32 %v1412_v4, 0.0 }
 0x20f   :  { %v1845_v24 = vmax.f32 %v1205_v62, 0.0  ;;  %v1703_v36 = vmax.f32 %v1414_v29, 0.0  ;;  %v1208_v38 = vpop.f32.mrb[92].mxu1  ;;  %v1417_v51 = vpop.f32.mrb[92].mxu0 }
 0x210   :  { %v4329_v14 = vpack.c.bf16 %v1844_v13, %v1838_v9  ;;  %v2782_v16 = vpack.c.bf16 %v1702_v61, %v1696_v39  ;;  %v1210_v43 = vpop.f32.mrb[93].mxu1  ;;  %v1419_v44 = vpop.f32.mrb[93].mxu0  ;;  %2679 = vmatpush1.bf16.msra.mxu1 %v4686_v12  ;;  %v1209_v8 = vadd.f32 %v1208_v38, %v4680_v47  ;;  %v1418_v3 = vadd.f32 %v1417_v51, %v4688_v52  ;;  %v4693_v12 = vld [vmem:[#allocation52_spill] sm:$0xff] }
 0x211   :  { %v4332_v57 = vpack.c.bf16 %v1845_v24, %v1839_v35  ;;  %v2780_v45 = vpack.c.bf16 %v1703_v36, %v1697_v19  ;;  %2681 = vmatprep.subr.bf16.mxu1 %v4687_v54  ;;  %v1211_v56 = vadd.f32 %v1210_v43, %v4680_v47  ;;  %v1420_v40 = vadd.f32 %v1419_v44, %v4688_v52 }
 0x212   :  { %v1850_v25 = vmax.f32 %v1209_v8, 0.0  ;;  %v1708_v62 = vmax.f32 %v1418_v3, 0.0  ;;  %v4695_v8 = vld [vmem:[#allocation8_spill] sm:$0xff] }
 0x213   :  { %v1214_v30 = vpop.f32.mrb[94].mxu1  ;;  %v1423_v20 = vpop.f32.mrb[94].mxu0  ;;  %2781 = vmatprep.subr.bf16.mxu0 %v2780_v45  ;;  %v1851_v9 = vmax.f32 %v1211_v56, 0.0  ;;  %v1709_v39 = vmax.f32 %v1420_v40, 0.0  ;;  %v4694_v45 = vld [vmem:[#allocation32_spill] sm:$0xff] }
 0x214   :  { %v1215_v10 = vadd.f32 %v1214_v30, %v4681_v49  ;;  %v1424_v0 = vadd.f32 %v1423_v20, %v4689_v28  ;;  %v1216_v7 = vpop.f32.mrb[95].mxu1  ;;  %v1425_v18 = vpop.f32.mrb[95].mxu0  ;;  %2683 = vmatpush1.bf16.msra.mxu1 %v4690_v59  ;;  %2783 = vmatpush1.bf16.msra.mxu0 %v2782_v16  ;;  %v4692_v16 = vld [vmem:[#allocation50_spill] sm:$0xff]  ;;  %v4696_v20 = vld [vmem:[#allocation33_spill] sm:$0xff]  ;;  %v4698_v59 = vld [vmem:[#allocation19_spill] sm:$0xff] }
 0x215   :  { %v1217_v4 = vadd.f32 %v1216_v7, %v4681_v49  ;;  %v1426_v41 = vadd.f32 %v1425_v18, %v4689_v28  ;;  %2685 = vmatprep.subr.bf16.mxu1 %v4691_v11  ;;  %v4697_v28 = vld [vmem:[#allocation9_spill] sm:$0xff] }
 0x216   :  { %v1856_v29 = vmax.f32 %v1215_v10, 0.0  ;;  %v1714_v48 = vmax.f32 %v1424_v0, 0.0  ;;  %v4699_v11 = vld [vmem:[#allocation21_spill] sm:$0xff] }
 0x217   :  { %v1857_v13 = vmax.f32 %v1217_v4, 0.0  ;;  %v1715_v61 = vmax.f32 %v1426_v41, 0.0  ;;  %v1220_v35 = vpop.f32.mrb[96].mxu1  ;;  %v1429_v19 = vpop.f32.mrb[96].mxu0 }
 0x218   :  { %v4345_v24 = vpack.c.bf16 %v1856_v29, %v1850_v25  ;;  %v2786_v36 = vpack.c.bf16 %v1714_v48, %v1708_v62  ;;  %v1222_v38 = vpop.f32.mrb[97].mxu1  ;;  %v1431_v51 = vpop.f32.mrb[97].mxu0  ;;  %2687 = vmatpush1.bf16.msra.mxu1 %v4692_v16  ;;  %v1221_v54 = vadd.f32 %v1220_v35, %v4694_v45  ;;  %v1430_v52 = vadd.f32 %v1429_v19, %v4695_v8 }
 0x219   :  { %v4348_v43 = vpack.c.bf16 %v1857_v13, %v1851_v9  ;;  %v2784_v44 = vpack.c.bf16 %v1715_v61, %v1709_v39  ;;  %2689 = vmatprep.subr.bf16.mxu1 %v4693_v12  ;;  %v1223_v3 = vadd.f32 %v1222_v38, %v4694_v45  ;;  %v1432_v56 = vadd.f32 %v1431_v51, %v4695_v8 }
 0x21a   :  { %v1862_v25 = vmax.f32 %v1221_v54, 0.0  ;;  %v1720_v62 = vmax.f32 %v1430_v52, 0.0  ;;  %v4701_v54 = vld [vmem:[#allocation23_spill] sm:$0xff]  ;;  %v4702_v52 = vld [vmem:[#allocation34_spill] sm:$0xff] }
 0x21b   :  { %v1226_v40 = vpop.f32.mrb[98].mxu1  ;;  %v1435_v30 = vpop.f32.mrb[98].mxu0  ;;  %2785 = vmatprep.subr.bf16.mxu0 %v2784_v44  ;;  %v1863_v9 = vmax.f32 %v1223_v3, 0.0  ;;  %v1721_v39 = vmax.f32 %v1432_v56, 0.0  ;;  %v4700_v44 = vld [vmem:[#allocation20_spill] sm:$0xff]  ;;  %v4703_v3 = vld [vmem:[#allocation10_spill] sm:$0xff] }
 0x21c   :  { %v1227_v10 = vadd.f32 %v1226_v40, %v4696_v20  ;;  %v1436_v0 = vadd.f32 %v1435_v30, %v4697_v28  ;;  %v1228_v7 = vpop.f32.mrb[99].mxu1  ;;  %v1437_v18 = vpop.f32.mrb[99].mxu0  ;;  %2691 = vmatpush1.bf16.msra.mxu1 %v4698_v59  ;;  %2787 = vmatpush1.bf16.msra.mxu0 %v2786_v36  ;;  %v4705_v59 = vld [vmem:[#allocation11_spill] sm:$0xff] }
 0x21d   :  { %v1229_v4 = vadd.f32 %v1228_v7, %v4696_v20  ;;  %v1438_v41 = vadd.f32 %v1437_v18, %v4697_v28  ;;  %2693 = vmatprep.subr.bf16.mxu1 %v4699_v11  ;;  %v4704_v7 = vld [vmem:[#allocation35_spill] sm:$0xff] }
 0x21e   :  { %v1868_v29 = vmax.f32 %v1227_v10, 0.0  ;;  %v1726_v48 = vmax.f32 %v1436_v0, 0.0 }
 0x21f   :  { %v1869_v13 = vmax.f32 %v1229_v4, 0.0  ;;  %v1727_v61 = vmax.f32 %v1438_v41, 0.0  ;;  %v1232_v35 = vpop.f32.mrb[100].mxu1  ;;  %v1441_v19 = vpop.f32.mrb[100].mxu0 }
 0x220   :  { %v4361_v38 = vpack.c.bf16 %v1868_v29, %v1862_v25  ;;  %v2790_v51 = vpack.c.bf16 %v1726_v48, %v1720_v62  ;;  %v1234_v36 = vpop.f32.mrb[101].mxu1  ;;  %v1443_v16 = vpop.f32.mrb[101].mxu0  ;;  %2695 = vmatpush1.bf16.msra.mxu1 %v4700_v44  ;;  %v1233_v40 = vadd.f32 %v1232_v35, %v4702_v52  ;;  %v1442_v56 = vadd.f32 %v1441_v19, %v4703_v3  ;;  %v4706_v25 = vld [vmem:[#allocation22_spill] sm:$0xff]  ;;  %v4707_v48 = vld [vmem:[#allocation25_spill] sm:$0xff] }
 0x221   :  { %v4364_v12 = vpack.c.bf16 %v1869_v13, %v1863_v9  ;;  %v2788_v8 = vpack.c.bf16 %v1727_v61, %v1721_v39  ;;  %2697 = vmatprep.subr.bf16.mxu1 %v4701_v54  ;;  %v1235_v30 = vadd.f32 %v1234_v36, %v4702_v52  ;;  %v1444_v10 = vadd.f32 %v1443_v16, %v4703_v3 }
 0x222   :  { %v1874_v9 = vmax.f32 %v1233_v40, 0.0  ;;  %v1732_v39 = vmax.f32 %v1442_v56, 0.0  ;;  %v4709_v40 = vld [vmem:[#allocation36_spill] sm:$0xff] }
 0x223   :  { %v1238_v28 = vpop.f32.mrb[102].mxu1  ;;  %v1447_v0 = vpop.f32.mrb[102].mxu0  ;;  %2789 = vmatprep.subr.bf16.mxu0 %v2788_v8  ;;  %v1875_v35 = vmax.f32 %v1235_v30, 0.0  ;;  %v1733_v19 = vmax.f32 %v1444_v10, 0.0  ;;  %v4710_v30 = vld [vmem:[#allocation12_spill] sm:$0xff] }
 0x224   :  { %v1239_v18 = vadd.f32 %v1238_v28, %v4704_v7  ;;  %v1448_v4 = vadd.f32 %v1447_v0, %v4705_v59  ;;  %v1240_v41 = vpop.f32.mrb[103].mxu1  ;;  %v1449_v11 = vpop.f32.mrb[103].mxu0  ;;  %2699 = vmatpush1.bf16.msra.mxu1 %v4706_v25  ;;  %2791 = vmatpush1.bf16.msra.mxu0 %v2790_v51  ;;  %v4708_v0 = vld [vmem:[#allocation24_spill] sm:$0xff] }
 0x225   :  { %v1241_v62 = vadd.f32 %v1240_v41, %v4704_v7  ;;  %v1450_v29 = vadd.f32 %v1449_v11, %v4705_v59  ;;  %2701 = vmatprep.subr.bf16.mxu1 %v4707_v48  ;;  %v4712_v48 = vld [vmem:[#allocation13_spill] sm:$0xff] }
 0x226   :  { %v1880_v13 = vmax.f32 %v1239_v18, 0.0  ;;  %v1738_v61 = vmax.f32 %v1448_v4, 0.0 }
 0x227   :  { %v1881_v36 = vmax.f32 %v1241_v62, 0.0  ;;  %v1739_v16 = vmax.f32 %v1450_v29, 0.0  ;;  %v1244_v44 = vpop.f32.mrb[104].mxu1  ;;  %v1453_v8 = vpop.f32.mrb[104].mxu0  ;;  %v4711_v62 = vld [vmem:[#allocation37_spill] sm:$0xff] }
 0x228   :  { %v4377_v54 = vpack.c.bf16 %v1880_v13, %v1874_v9  ;;  %v2794_v3 = vpack.c.bf16 %v1738_v61, %v1732_v39  ;;  %v1246_v51 = vpop.f32.mrb[105].mxu1  ;;  %v1455_v28 = vpop.f32.mrb[105].mxu0  ;;  %2703 = vmatpush1.bf16.msra.mxu1 %v4708_v0  ;;  %v1245_v56 = vadd.f32 %v1244_v44, %v4709_v40  ;;  %v1454_v10 = vadd.f32 %v1453_v8, %v4710_v30 }
 0x229   :  { %v4380_v59 = vpack.c.bf16 %v1881_v36, %v1875_v35  ;;  %v2792_v41 = vpack.c.bf16 %v1739_v16, %v1733_v19  ;;  %2705 = vmatprep.subr.bf16.mxu1 %v4222_v2  ;;  %v1247_v18 = vadd.f32 %v1246_v51, %v4709_v40  ;;  %v1456_v4 = vadd.f32 %v1455_v28, %v4710_v30  ;;  %v4713_v35 = vld [vmem:[#allocation27_spill] sm:$0xff] }
 0x22a   :  { %v1886_v19 = vmax.f32 %v1245_v56, 0.0  ;;  %v1744_v36 = vmax.f32 %v1454_v10, 0.0  ;;  %v4715_v56 = vld [vmem:[#allocation39_spill] sm:$0xff] }
 0x22b   :  { %v1250_v11 = vpop.f32.mrb[106].mxu1  ;;  %v1459_v25 = vpop.f32.mrb[106].mxu0  ;;  %2793 = vmatprep.subr.bf16.mxu0 %v2792_v41  ;;  %v1887_v8 = vmax.f32 %v1247_v18, 0.0  ;;  %v1745_v51 = vmax.f32 %v1456_v4, 0.0  ;;  %v4716_v18 = vld [vmem:[#allocation14_spill] sm:$0xff] }
 0x22c   :  { %v1251_v29 = vadd.f32 %v1250_v11, %v4711_v62  ;;  %v1460_v9 = vadd.f32 %v1459_v25, %v4712_v48  ;;  %v1252_v39 = vpop.f32.mrb[107].mxu1  ;;  %v1461_v13 = vpop.f32.mrb[107].mxu0  ;;  %2707 = vmatpush1.bf16.msra.mxu1 %v4219_v50  ;;  %2795 = vmatpush1.bf16.msra.mxu0 %v2794_v3 }
 0x22d   :  { %v1253_v2 = vadd.f32 %v1252_v39, %v4711_v62  ;;  %v1462_v61 = vadd.f32 %v1461_v13, %v4712_v48  ;;  %2709 = vmatprep.subr.bf16.mxu1 %v4713_v35  ;;  %v4714_v39 = vld [vmem:[#allocation26_spill] sm:$0xff]  ;;  %v4717_v35 = vld [vmem:[#allocation40_spill] sm:$0xff] }
 0x22e   :  { %v1892_v16 = vmax.f32 %v1251_v29, 0.0  ;;  %v1750_v44 = vmax.f32 %v1460_v9, 0.0 }
 0x22f   :  { %v1893_v28 = vmax.f32 %v1253_v2, 0.0  ;;  %v1751_v0 = vmax.f32 %v1462_v61, 0.0  ;;  %v1256_v41 = vpop.f32.mrb[108].mxu1  ;;  %v1465_v30 = vpop.f32.mrb[108].mxu0 }
 0x230   :  { %v4393_v11 = vpack.c.bf16 %v1892_v16, %v1886_v19  ;;  %v2798_v50 = vpack.c.bf16 %v1750_v44, %v1744_v36  ;;  %v1258_v3 = vpop.f32.mrb[109].mxu1  ;;  %v1467_v25 = vpop.f32.mrb[109].mxu0  ;;  %2711 = vmatpush1.bf16.msra.mxu1 %v4714_v39  ;;  %v1257_v10 = vadd.f32 %v1256_v41, %v4715_v56  ;;  %v1466_v4 = vadd.f32 %v1465_v30, %v4716_v18  ;;  %v4718_v36 = vld [vmem:[#allocation15_spill] sm:$0xff] }
 0x231   :  { %v4396_v48 = vpack.c.bf16 %v1893_v28, %v1887_v8  ;;  %v2796_v13 = vpack.c.bf16 %v1751_v0, %v1745_v51  ;;  %2713 = vmatprep.subr.bf16.mxu1 %v4247_v53  ;;  %v1259_v29 = vadd.f32 %v1258_v3, %v4715_v56  ;;  %v1468_v9 = vadd.f32 %v1467_v25, %v4716_v18 }
 0x232   :  { %v1898_v28 = vmax.f32 %v1257_v10, 0.0  ;;  %v1756_v0 = vmax.f32 %v1466_v4, 0.0  ;;  %v4719_v10 = vld [vmem:[#allocation41_spill] sm:$0xff] }
 0x233   :  { %v1262_v2 = vpop.f32.mrb[110].mxu1  ;;  %v1471_v61 = vpop.f32.mrb[110].mxu0  ;;  %2797 = vmatprep.subr.bf16.mxu0 %v2796_v13  ;;  %v1899_v3 = vmax.f32 %v1259_v29, 0.0  ;;  %v1757_v25 = vmax.f32 %v1468_v9, 0.0  ;;  %v4720_v29 = vld [vmem:[#allocation16_spill] sm:$0xff] }
 0x234   :  { %v1263_v19 = vadd.f32 %v1262_v2, %v4717_v35  ;;  %v1472_v16 = vadd.f32 %v1471_v61, %v4718_v36  ;;  %v1264_v44 = vpop.f32.mrb[111].mxu1  ;;  %v1473_v8 = vpop.f32.mrb[111].mxu0  ;;  %2715 = vmatpush1.bf16.msra.mxu1 %v4245_v6  ;;  %2799 = vmatpush1.bf16.msra.mxu0 %v2798_v50 }
 0x235   :  { %v1265_v53 = vadd.f32 %v1264_v44, %v4717_v35  ;;  %v1474_v51 = vadd.f32 %v1473_v8, %v4718_v36  ;;  %2717 = vmatprep.subr.bf16.mxu1 %v4261_v26 }
 0x236   :  { %v1904_v41 = vmax.f32 %v1263_v19, 0.0  ;;  %v1762_v30 = vmax.f32 %v1472_v16, 0.0 }
 0x237   :  { %v1905_v39 = vmax.f32 %v1265_v53, 0.0  ;;  %v1763_v13 = vmax.f32 %v1474_v51, 0.0  ;;  %v1268_v18 = vpop.f32.mrb[112].mxu1  ;;  %v1477_v2 = vpop.f32.mrb[112].mxu0  ;;  %v4721_v53 = vld [vmem:[#allocation42_spill] sm:$0xff] }
 0x238   :  { %v4409_v61 = vpack.c.bf16 %v1904_v41, %v1898_v28  ;;  %v2802_v6 = vpack.c.bf16 %v1762_v30, %v1756_v0  ;;  %v1270_v50 = vpop.f32.mrb[113].mxu1  ;;  %v1479_v56 = vpop.f32.mrb[113].mxu0  ;;  %2719 = vmatpush1.bf16.msra.mxu1 %v4258_v63  ;;  %v1269_v4 = vadd.f32 %v1268_v18, %v4719_v10  ;;  %v1478_v9 = vadd.f32 %v1477_v2, %v4720_v29  ;;  %v4722_v28 = vld [vmem:[#allocation17_spill] sm:$0xff] }
 0x239   :  { %v4412_v36 = vpack.c.bf16 %v1905_v39, %v1899_v3  ;;  %v2800_v26 = vpack.c.bf16 %v1763_v13, %v1757_v25  ;;  %2721 = vmatprep.subr.bf16.mxu1 %v4277_v31  ;;  %v1271_v19 = vadd.f32 %v1270_v50, %v4719_v10  ;;  %v1480_v16 = vadd.f32 %v1479_v56, %v4720_v29 }
 0x23a   :  { %v1910_v3 = vmax.f32 %v1269_v4, 0.0  ;;  %v1768_v56 = vmax.f32 %v1478_v9, 0.0  ;;  %v4723_v4 = vld [vmem:[#allocation43_spill] sm:$0xff] }
 0x23b   :  { %v1274_v44 = vpop.f32.mrb[114].mxu1  ;;  %v1483_v8 = vpop.f32.mrb[114].mxu0  ;;  %2801 = vmatprep.subr.bf16.mxu0 %v2800_v26  ;;  %v1911_v13 = vmax.f32 %v1271_v19, 0.0  ;;  %v1769_v18 = vmax.f32 %v1480_v16, 0.0  ;;  %v4724_v19 = vld [vmem:[#allocation18_spill] sm:$0xff] }
 0x23c   :  { %v1275_v51 = vadd.f32 %v1274_v44, %v4721_v53  ;;  %v1484_v63 = vadd.f32 %v1483_v8, %v4722_v28  ;;  %v1276_v0 = vpop.f32.mrb[115].mxu1  ;;  %v1485_v41 = vpop.f32.mrb[115].mxu0  ;;  %2723 = vmatpush1.bf16.msra.mxu1 %v4274_v55  ;;  %2803 = vmatpush1.bf16.msra.mxu0 %v2802_v6 }
 0x23d   :  { %v1277_v31 = vadd.f32 %v1276_v0, %v4721_v53  ;;  %v1486_v30 = vadd.f32 %v1485_v41, %v4722_v28  ;;  %2725 = vmatprep.subr.bf16.mxu1 %v4293_v33 }
 0x23e   :  { %v1916_v25 = vmax.f32 %v1275_v51, 0.0  ;;  %v1774_v39 = vmax.f32 %v1484_v63, 0.0 }
 0x23f   :  { %v1917_v2 = vmax.f32 %v1277_v31, 0.0  ;;  %v1775_v50 = vmax.f32 %v1486_v30, 0.0  ;;  %v1280_v26 = vpop.f32.mrb[116].mxu1  ;;  %v1489_v29 = vpop.f32.mrb[116].mxu0  ;;  %v4725_v31 = vld [vmem:[#allocation44_spill] sm:$0xff] }
 0x240   :  { %v4425_v44 = vpack.c.bf16 %v1916_v25, %v1910_v3  ;;  %v2806_v55 = vpack.c.bf16 %v1774_v39, %v1768_v56  ;;  %v1282_v6 = vpop.f32.mrb[117].mxu1  ;;  %v1491_v8 = vpop.f32.mrb[117].mxu0  ;;  %2727 = vmatpush1.bf16.msra.mxu1 %v4290_v27  ;;  %v1281_v9 = vadd.f32 %v1280_v26, %v4723_v4  ;;  %v1490_v16 = vadd.f32 %v1489_v29, %v4724_v19 }
 0x241   :  { %v4428_v28 = vpack.c.bf16 %v1917_v2, %v1911_v13  ;;  %v2804_v33 = vpack.c.bf16 %v1775_v50, %v1769_v18  ;;  %2729 = vmatprep.subr.bf16.mxu1 %v4315_v37  ;;  %v1283_v51 = vadd.f32 %v1282_v6, %v4723_v4  ;;  %v1492_v63 = vadd.f32 %v1491_v8, %v4724_v19 }
 0x242   :  { %v1922_v39 = vmax.f32 %v1281_v9, 0.0  ;;  %v1780_v13 = vmax.f32 %v1490_v16, 0.0 }
 0x243   :  { %v1286_v0 = vpop.f32.mrb[118].mxu1  ;;  %v1495_v41 = vpop.f32.mrb[118].mxu0  ;;  %2805 = vmatprep.subr.bf16.mxu0 %v2804_v33  ;;  %v1923_v50 = vmax.f32 %v1283_v51, 0.0  ;;  %v1781_v26 = vmax.f32 %v1492_v63, 0.0  ;;  %v4726_v33 = vmov 0.0  }
 0x244   :  { %v1287_v30 = vadd.f32 %v1286_v0, %v4725_v31  ;;  %v1496_v27 = vadd.f32 %v1495_v41, %v4659_v60  ;;  %v1288_v3 = vpop.f32.mrb[119].mxu1  ;;  %v1497_v56 = vpop.f32.mrb[119].mxu0  ;;  %2731 = vmatpush1.bf16.msra.mxu1 %v4312_v32  ;;  %2807 = vmatpush1.bf16.msra.mxu0 %v2806_v55  ;;  %v4444_v32 = vld [vmem:[%s4531_s3] sm:$0x77]  ;;  %s2951_s3 = smov [#allocation2]  }
 0x245   :  { %v1289_v37 = vadd.f32 %v1288_v3, %v4725_v31  ;;  %v1498_v25 = vadd.f32 %v1497_v56, %v4659_v60  ;;  %2733 = vmatprep.subr.bf16.mxu1 %v4332_v57  ;;  %s2396_s7 = sshll.u32 %s2951_s3, 4  ;;  %s2397_s7 = int_to_ptr.vmem [resolvable:$true] %s2396_s7 }
 0x246   :  { %v1928_v18 = vmax.f32 %v1287_v30, 0.0  ;;  %v1786_v2 = vmax.f32 %v1496_v27, 0.0  ;;  %s2922_s8 = scalar_lea.vmem %s2397_s7, 384  ;;  %p2927_p1 = scmp.lt.s32.totalorder %s2397_s7, %s2397_s7 }
 0x247   :  { %v1929_v29 = vmax.f32 %v1289_v37, 0.0  ;;  %v1787_v6 = vmax.f32 %v1498_v25, 0.0  ;;  %v1501_v8 = vpop.f32.mrb[120].mxu0  ;;  %2150 = vmatmul.mubr.f32.vlgmr.msra.gmra.mrb[122].mxu1 %v4444_v32  ;;  %p2923_p0 = scmp.ne.s32.totalorder %s2397_s7, %s2922_s8  ;;  %p2928_p2 = scmp.lt.s32.totalorder %s2922_s8, %s2922_s8 }
 0x248   :  { %v4447_v55 = vpack.c.bf16 %v1928_v18, %v1922_v39  ;;  %v2810_v60 = vpack.c.bf16 %v1786_v2, %v1780_v13  ;;  %v1503_v57 = vpop.f32.mrb[121].mxu0  ;;  %2735 = vmatpush1.bf16.msra.mxu1 %v4329_v14  ;;  %2220 = vmatprep.mubr.f32.mxu1 %v4726_v33  ;;  %v1502_v16 = vadd.f32 %v1501_v8, %v4662_v1 }
 0x249   :  { %v2760_v9 = vpack.c.bf16 %v1929_v29, %v1923_v50  ;;  %v2808_v19 = vpack.c.bf16 %v1787_v6, %v1781_v26  ;;  %2737 = vmatprep.subr.bf16.mxu1 %v4348_v43  ;;  %v1504_v51 = vadd.f32 %v1503_v57, %v4662_v1  ;;  %p2929_p3 = por %p2928_p2, %p2927_p1 }
 0x24a   :  { %v1792_v30 = vmax.f32 %v1502_v16, 0.0 }
 0x24b   :  { %v1507_v63 = vpop.f32.mrb[122].mxu0  ;;  %2809 = vmatprep.subr.bf16.mxu0 %v2808_v19  ;;  %v1793_v3 = vmax.f32 %v1504_v51, 0.0  ;;  %p2930_p4 = pnand %p2929_p3, %p2923_p0 }
 0x24c   :  { %v1508_v0 = vadd.f32 %v1507_v63, %v4663_v34  ;;  %v1509_v41 = vpop.f32.mrb[123].mxu0  ;;  %2739 = vmatpush1.bf16.msra.mxu1 %v4345_v24  ;;  %2811 = vmatpush1.bf16.msra.mxu0 %v2810_v60 }
 0x24d   :  { %v1510_v14 = vadd.f32 %v1509_v41, %v4663_v34  ;;  %2741 = vmatprep.subr.bf16.mxu1 %v4364_v12 }
 0x24e   :  { %v1798_v27 = vmax.f32 %v1508_v0, 0.0 }
 0x24f   :  { %v1799_v43 = vmax.f32 %v1510_v14, 0.0  ;;  %v1513_v56 = vpop.f32.mrb[124].mxu0 }
 0x250   :  { %v2814_v37 = vpack.c.bf16 %v1798_v27, %v1792_v30  ;;  %v1515_v25 = vpop.f32.mrb[125].mxu0  ;;  %2743 = vmatpush1.bf16.msra.mxu1 %v4361_v38  ;;  %v1514_v39 = vadd.f32 %v1513_v56, %v4666_v22 }
 0x251   :  { %v2812_v1 = vpack.c.bf16 %v1799_v43, %v1793_v3  ;;  %2745 = vmatprep.subr.bf16.mxu1 %v4380_v59  ;;  %v1516_v24 = vadd.f32 %v1515_v25, %v4666_v22 }
 0x252   :  { %v1804_v38 = vmax.f32 %v1514_v39, 0.0 }
 0x253   :  { %v1519_v13 = vpop.f32.mrb[126].mxu0  ;;  %2813 = vmatprep.subr.bf16.mxu0 %v2812_v1  ;;  %v1805_v50 = vmax.f32 %v1516_v24, 0.0 }
 0x254   :  { %v1520_v34 = vadd.f32 %v1519_v13, %v4667_v15  ;;  %v1521_v12 = vpop.f32.mrb[127].mxu0  ;;  %2747 = vmatpush1.bf16.msra.mxu1 %v4377_v54  ;;  %2815 = vmatpush1.bf16.msra.mxu0 %v2814_v37 }
 0x255   :  { %v1522_v18 = vadd.f32 %v1521_v12, %v4667_v15  ;;  %2749 = vmatprep.subr.bf16.mxu1 %v4396_v48 }
 0x256   :  { %v1810_v2 = vmax.f32 %v1520_v34, 0.0 }
 0x257   :  { %v1811_v59 = vmax.f32 %v1522_v18, 0.0  ;;  %v1525_v26 = vpop.f32.mrb[128].mxu0 }
 0x258   :  { %v2818_v29 = vpack.c.bf16 %v1810_v2, %v1804_v38  ;;  %v1527_v6 = vpop.f32.mrb[129].mxu0  ;;  %2751 = vmatpush1.bf16.msra.mxu1 %v4393_v11  ;;  %v1526_v8 = vadd.f32 %v1525_v26, %v4670_v23 }
 0x259   :  { %v2816_v22 = vpack.c.bf16 %v1811_v59, %v1805_v50  ;;  %2753 = vmatprep.subr.bf16.mxu1 %v4412_v36  ;;  %v1528_v54 = vadd.f32 %v1527_v6, %v4670_v23 }
 0x25a   :  { %v1816_v11 = vmax.f32 %v1526_v8, 0.0 }
 0x25b   :  { %v1531_v60 = vpop.f32.mrb[130].mxu0  ;;  %2817 = vmatprep.subr.bf16.mxu0 %v2816_v22  ;;  %v1817_v16 = vmax.f32 %v1528_v54, 0.0 }
 0x25c   :  { %v1532_v15 = vadd.f32 %v1531_v60, %v4671_v42  ;;  %v1533_v48 = vpop.f32.mrb[131].mxu0  ;;  %2755 = vmatpush1.bf16.msra.mxu1 %v4409_v61  ;;  %2819 = vmatpush1.bf16.msra.mxu0 %v2818_v29 }
 0x25d   :  { %v1534_v57 = vadd.f32 %v1533_v48, %v4671_v42  ;;  %2757 = vmatprep.subr.bf16.mxu1 %v4428_v28 }
 0x25e   :  { %v1822_v19 = vmax.f32 %v1532_v15, 0.0 }
 0x25f   :  { %v1823_v36 = vmax.f32 %v1534_v57, 0.0  ;;  %v1537_v51 = vpop.f32.mrb[132].mxu0 }
 0x260   :  { %v2822_v63 = vpack.c.bf16 %v1822_v19, %v1816_v11  ;;  %v1539_v0 = vpop.f32.mrb[133].mxu0  ;;  %2759 = vmatpush1.bf16.msra.mxu1 %v4425_v44  ;;  %v1538_v41 = vadd.f32 %v1537_v51, %v4674_v46 }
 0x261   :  { %v2820_v23 = vpack.c.bf16 %v1823_v36, %v1817_v16  ;;  %2761 = vmatprep.subr.bf16.mxu1 %v2760_v9  ;;  %v1540_v61 = vadd.f32 %v1539_v0, %v4674_v46 }
 0x262   :  { %v1828_v27 = vmax.f32 %v1538_v41, 0.0 }
 0x263   :  { %v1543_v14 = vpop.f32.mrb[134].mxu0  ;;  %2821 = vmatprep.subr.bf16.mxu0 %v2820_v23  ;;  %v1829_v43 = vmax.f32 %v1540_v61, 0.0 }
 0x264   :  { %v1544_v42 = vadd.f32 %v1543_v14, %v4675_v21  ;;  %v1545_v28 = vpop.f32.mrb[135].mxu0  ;;  %2763 = vmatpush1.bf16.msra.mxu1 %v4447_v55  ;;  %2823 = vmatpush1.bf16.msra.mxu0 %v2822_v63 }
 0x265   :  { %v1546_v30 = vadd.f32 %v1545_v28, %v4675_v21 }
 0x266   :  { %v1834_v3 = vmax.f32 %v1544_v42, 0.0 }
 0x267   :  { %v1835_v44 = vmax.f32 %v1546_v30, 0.0  ;;  %v1549_v56 = vpop.f32.mrb[136].mxu0  ;;  %2221 = vmatmul.mubr.f32.vlgmr.msra.gmra.mrb[122].mxu1 %v4306_v5 }
 0x268   :  { %v2826_v9 = vpack.c.bf16 %v1834_v3, %v1828_v27  ;;  %v1551_v37 = vpop.f32.mrb[137].mxu0  ;;  %v1550_v25 = vadd.f32 %v1549_v56, %v4676_v17 }
 0x269   :  { %v2824_v46 = vpack.c.bf16 %v1835_v44, %v1829_v43  ;;  %v1552_v1 = vadd.f32 %v1551_v37, %v4676_v17 }
 0x26a   :  { %v1840_v13 = vmax.f32 %v1550_v25, 0.0 }
 0x26b   :  { %v1555_v39 = vpop.f32.mrb[138].mxu0  ;;  %2825 = vmatprep.subr.bf16.mxu0 %v2824_v46  ;;  %v1841_v12 = vmax.f32 %v1552_v1, 0.0 }
 0x26c   :  { %v1556_v55 = vadd.f32 %v1555_v39, %v4677_v58  ;;  %v1557_v24 = vpop.f32.mrb[139].mxu0  ;;  %2827 = vmatpush1.bf16.msra.mxu0 %v2826_v9 }
 0x26d   :  { %v1558_v21 = vadd.f32 %v1557_v24, %v4677_v58 }
 0x26e   :  { %v1846_v34 = vmax.f32 %v1556_v55, 0.0 }
 0x26f   :  { %v1847_v18 = vmax.f32 %v1558_v21, 0.0  ;;  %v1561_v38 = vpop.f32.mrb[140].mxu0  ;;  %2292 = vmatmul.mubr.f32.vlgmr.msra.gmra.mrb[168].mxu0 %v4444_v32 }
 0x270   :  { %v2830_v2 = vpack.c.bf16 %v1846_v34, %v1840_v13  ;;  %v1563_v50 = vpop.f32.mrb[141].mxu0  ;;  %2362 = vmatprep.mubr.f32.mxu0 %v4726_v33  ;;  %v1562_v59 = vadd.f32 %v1561_v38, %v4680_v47 }
 0x271   :  { %v2828_v17 = vpack.c.bf16 %v1847_v18, %v1841_v12  ;;  %v1564_v26 = vadd.f32 %v1563_v50, %v4680_v47 }
 0x272   :  { %v1852_v8 = vmax.f32 %v1562_v59, 0.0  ;;  %v4727_v59 = vld [vmem:[#allocation39_spill] sm:$0xff] }
 0x273   :  { %v1567_v29 = vpop.f32.mrb[142].mxu0  ;;  %2829 = vmatprep.subr.bf16.mxu0 %v2828_v17  ;;  %v1853_v32 = vmax.f32 %v1564_v26, 0.0 }
 0x274   :  { %v1568_v58 = vadd.f32 %v1567_v29, %v4681_v49  ;;  %v1569_v6 = vpop.f32.mrb[143].mxu0  ;;  %2831 = vmatpush1.bf16.msra.mxu0 %v2830_v2 }
 0x275   :  { %v1570_v22 = vadd.f32 %v1569_v6, %v4681_v49 }
 0x276   :  { %v1858_v54 = vmax.f32 %v1568_v58, 0.0 }
 0x277   :  { %v1859_v60 = vmax.f32 %v1570_v22, 0.0  ;;  %v1573_v15 = vpop.f32.mrb[144].mxu0 }
 0x278   :  { %v2834_v48 = vpack.c.bf16 %v1858_v54, %v1852_v8  ;;  %v1575_v33 = vpop.f32.mrb[145].mxu0  ;;  %v1574_v11 = vadd.f32 %v1573_v15, %v4694_v45 }
 0x279   :  { %v2832_v57 = vpack.c.bf16 %v1859_v60, %v1853_v32  ;;  %v1576_v47 = vadd.f32 %v1575_v33, %v4694_v45 }
 0x27a   :  { %v1864_v51 = vmax.f32 %v1574_v11, 0.0 }
 0x27b   :  { %v1579_v19 = vpop.f32.mrb[146].mxu0  ;;  %2833 = vmatprep.subr.bf16.mxu0 %v2832_v57  ;;  %v1865_v0 = vmax.f32 %v1576_v47, 0.0 }
 0x27c   :  { %v1580_v16 = vadd.f32 %v1579_v19, %v4696_v20  ;;  %v1581_v36 = vpop.f32.mrb[147].mxu0  ;;  %2835 = vmatpush1.bf16.msra.mxu0 %v2834_v48 }
 0x27d   :  { %v1582_v49 = vadd.f32 %v1581_v36, %v4696_v20 }
 0x27e   :  { %v1870_v63 = vmax.f32 %v1580_v16, 0.0 }
 0x27f   :  { %v1871_v23 = vmax.f32 %v1582_v49, 0.0  ;;  %v1585_v41 = vpop.f32.mrb[148].mxu0 }
 0x280   :  { %v2838_v61 = vpack.c.bf16 %v1870_v63, %v1864_v51  ;;  %v1587_v14 = vpop.f32.mrb[149].mxu0  ;;  %v1586_v28 = vadd.f32 %v1585_v41, %v4702_v52 }
 0x281   :  { %v2836_v42 = vpack.c.bf16 %v1871_v23, %v1865_v0  ;;  %v1588_v45 = vadd.f32 %v1587_v14, %v4702_v52 }
 0x282   :  { %v1876_v43 = vmax.f32 %v1586_v28, 0.0 }
 0x283   :  { %v1591_v30 = vpop.f32.mrb[150].mxu0  ;;  %2837 = vmatprep.subr.bf16.mxu0 %v2836_v42  ;;  %v1877_v56 = vmax.f32 %v1588_v45, 0.0 }
 0x284   :  { %v1592_v27 = vadd.f32 %v1591_v30, %v4704_v7  ;;  %v1593_v3 = vpop.f32.mrb[151].mxu0  ;;  %2839 = vmatpush1.bf16.msra.mxu0 %v2838_v61 }
 0x285   :  { %v1594_v20 = vadd.f32 %v1593_v3, %v4704_v7 }
 0x286   :  { %v1882_v44 = vmax.f32 %v1592_v27, 0.0 }
 0x287   :  { %v1883_v9 = vmax.f32 %v1594_v20, 0.0  ;;  %v1597_v37 = vpop.f32.mrb[152].mxu0 }
 0x288   :  { %v2842_v46 = vpack.c.bf16 %v1882_v44, %v1876_v43  ;;  %v1599_v25 = vpop.f32.mrb[153].mxu0  ;;  %v1598_v39 = vadd.f32 %v1597_v37, %v4709_v40 }
 0x289   :  { %v2840_v1 = vpack.c.bf16 %v1883_v9, %v1877_v56  ;;  %v1600_v52 = vadd.f32 %v1599_v25, %v4709_v40  ;;  %v1938_v56 = vpop.permute.xlu1 %1937 }
 0x28a   :  { %v1888_v13 = vmax.f32 %v1598_v39, 0.0 }
 0x28b   :  { %v1603_v55 = vpop.f32.mrb[154].mxu0  ;;  %2841 = vmatprep.subr.bf16.mxu0 %v2840_v1  ;;  %v1889_v12 = vmax.f32 %v1600_v52, 0.0 }
 0x28c   :  { %v1604_v24 = vadd.f32 %v1603_v55, %v4711_v62  ;;  %v1605_v21 = vpop.f32.mrb[155].mxu0  ;;  %2843 = vmatpush1.bf16.msra.mxu0 %v2842_v46 }
 0x28d   :  { %v1606_v7 = vadd.f32 %v1605_v21, %v4711_v62 }
 0x28e   :  { %v1894_v34 = vmax.f32 %v1604_v24, 0.0 }
 0x28f   :  { %v1895_v18 = vmax.f32 %v1606_v7, 0.0  ;;  %v1609_v38 = vpop.f32.mrb[156].mxu0 }
 0x290   :  { %v2846_v2 = vpack.c.bf16 %v1894_v34, %v1888_v13  ;;  %v1611_v50 = vpop.f32.mrb[157].mxu0  ;;  %v1610_v26 = vadd.f32 %v1609_v38, %v4727_v59 }
 0x291   :  { %v2844_v17 = vpack.c.bf16 %v1895_v18, %v1889_v12  ;;  %v1612_v40 = vadd.f32 %v1611_v50, %v4727_v59 }
 0x292   :  { %v1900_v22 = vmax.f32 %v1610_v26, 0.0 }
 0x293   :  { %v1615_v29 = vpop.f32.mrb[158].mxu0  ;;  %2845 = vmatprep.subr.bf16.mxu0 %v2844_v17  ;;  %v1901_v54 = vmax.f32 %v1612_v40, 0.0 }
 0x294   :  { %v1616_v58 = vadd.f32 %v1615_v29, %v4717_v35  ;;  %v1617_v6 = vpop.f32.mrb[159].mxu0  ;;  %2847 = vmatpush1.bf16.msra.mxu0 %v2846_v2 }
 0x295   :  { %v1618_v62 = vadd.f32 %v1617_v6, %v4717_v35 }
 0x296   :  { %v1906_v8 = vmax.f32 %v1616_v58, 0.0 }
 0x297   :  { %v1907_v32 = vmax.f32 %v1618_v62, 0.0  ;;  %v1621_v60 = vpop.f32.mrb[160].mxu0 }
 0x298   :  { %v2850_v15 = vpack.c.bf16 %v1906_v8, %v1900_v22  ;;  %v1623_v48 = vpop.f32.mrb[161].mxu0  ;;  %v1622_v57 = vadd.f32 %v1621_v60, %v4719_v10 }
 0x299   :  { %v2848_v33 = vpack.c.bf16 %v1907_v32, %v1901_v54  ;;  %v1624_v11 = vadd.f32 %v1623_v48, %v4719_v10 }
 0x29a   :  { %v1912_v36 = vmax.f32 %v1622_v57, 0.0 }
 0x29b   :  { %v1627_v47 = vpop.f32.mrb[162].mxu0  ;;  %2849 = vmatprep.subr.bf16.mxu0 %v2848_v33  ;;  %v1913_v51 = vmax.f32 %v1624_v11, 0.0 }
 0x29c   :  { %v1628_v19 = vadd.f32 %v1627_v47, %v4721_v53  ;;  %v1629_v16 = vpop.f32.mrb[163].mxu0  ;;  %2851 = vmatpush1.bf16.msra.mxu0 %v2850_v15 }
 0x29d   :  { %v1630_v35 = vadd.f32 %v1629_v16, %v4721_v53 }
 0x29e   :  { %v1918_v49 = vmax.f32 %v1628_v19, 0.0 }
 0x29f   :  { %v1919_v63 = vmax.f32 %v1630_v35, 0.0  ;;  %v1633_v0 = vpop.f32.mrb[164].mxu0 }
 0x2a0   :  { %v2854_v23 = vpack.c.bf16 %v1918_v49, %v1912_v36  ;;  %v1635_v41 = vpop.f32.mrb[165].mxu0  ;;  %v1634_v14 = vadd.f32 %v1633_v0, %v4723_v4 }
 0x2a1   :  { %v2852_v61 = vpack.c.bf16 %v1919_v63, %v1913_v51  ;;  %v1636_v10 = vadd.f32 %v1635_v41, %v4723_v4 }
 0x2a2   :  { %v1924_v30 = vmax.f32 %v1634_v14, 0.0 }
 0x2a3   :  { %v1639_v42 = vpop.f32.mrb[166].mxu0  ;;  %2853 = vmatprep.subr.bf16.mxu0 %v2852_v61  ;;  %v1925_v3 = vmax.f32 %v1636_v10, 0.0 }
 0x2a4   :  { %v1640_v28 = vadd.f32 %v1639_v42, %v4725_v31  ;;  %v1641_v45 = vpop.f32.mrb[167].mxu0  ;;  %2855 = vmatpush1.bf16.msra.mxu0 %v2854_v23 }
 0x2a5   :  { %v1642_v53 = vadd.f32 %v1641_v45, %v4725_v31 }
 0x2a6   :  { %v1930_v27 = vmax.f32 %v1640_v28, 0.0 }
 0x2a7   :  { %v1931_v20 = vmax.f32 %v1642_v53, 0.0 }
 0x2a8   :  { %v2858_v43 = vpack.c.bf16 %v1930_v27, %v1924_v30 }
 0x2a9   :  { %v2856_v44 = vpack.c.bf16 %v1931_v20, %v1925_v3 }
 0x2ab   :  { %2857 = vmatprep.subr.bf16.mxu0 %v2856_v44 }
 0x2ac   :  { %2859 = vmatpush1.bf16.msra.mxu0 %v2858_v43 }
 0x2af   :  { %2363 = vmatmul.mubr.f32.vlgmr.msra.gmra.mrb[168].mxu0 %v4306_v5 }
 0x2da   :  { %v2080_v4 = vpop.f32.mrb[120].mxu1 }
 0x2db   :  { %v2862_v9 = vadd.f32 %v2080_v4, %v1938_v56  ;;  %v2082_v37 = vpop.f32.mrb[121].mxu1 }
 0x2dc   :  { %v2863_v46 = vadd.f32 %v2082_v37, %v1938_v56 }
 0x2dd   :  { %v2369_v25 = vmax.f32 %v2862_v9, 0.0 }
 0x2de   :  { %v2370_v1 = vmax.f32 %v2863_v46, 0.0 }
 0x2e0   :  { %v2381_v39 = vcombine.low %v2369_v25, %v2370_v1 }
 0x2e2   :  { %2387 = vst [vmem:[#allocation2] sm:$0x77] %v2381_v39 }
 0x33a   :  { %v2222_v31 = vpop.f32.mrb[122].mxu1 }
 0x33b   :  { %v2864_v52 = vadd.f32 %v2222_v31, %v1938_v56  ;;  %v2224_v55 = vpop.f32.mrb[123].mxu1 }
 0x33c   :  { %v2865_v24 = vadd.f32 %v2224_v55, %v1938_v56 }
 0x33d   :  { %v2371_v21 = vmax.f32 %v2864_v52, 0.0 }
 0x33e   :  { %v2372_v7 = vmax.f32 %v2865_v24, 0.0 }
 0x340   :  { %v2382_v13 = vcombine.low %v2371_v21, %v2372_v7 }
 0x342   :  { %2388 = vst [vmem:[#allocation2 + $0x8] sm:$0x77] %v2382_v13 }
 0x382   :  { %v2364_v34 = vpop.f32.mrb[168].mxu0 }
 0x383   :  { %v2866_v12 = vadd.f32 %v2364_v34, %v1938_v56  ;;  %v2366_v5 = vpop.f32.mrb[169].mxu0 }
 0x384   :  { %v2867_v18 = vadd.f32 %v2366_v5, %v1938_v56 }
 0x385   :  { %v2373_v38 = vmax.f32 %v2866_v12, 0.0 }
 0x386   :  { %v2374_v2 = vmax.f32 %v2867_v18, 0.0 }
 0x388   :  { %v2383_v50 = vcombine.low %v2373_v38, %v2374_v2 }
 0x38a   :  { %2389 = vst [vmem:[#allocation2 + $0x10] sm:$0x77] %v2383_v50 }
 0x38b   :  { %2933 = shalt.err (!%p2930_p4)
}
 0x38c   :  { %s2934_s11 = scalar_lea.hbm %s4533_s5, 384 }
 0x38d   :  { %p2935_p5 = scmp.ne.s32.totalorder %s4533_s5, %s2934_s11  ;;  %p2938_p6 = scmp.lt.u32.totalorder %s2934_s11, %s4533_s5 }
 0x38f   :  { %p2940_p7 = pnand %p2938_p6, %p2935_p5 }
 0x391   :  { %2943 = shalt.err (!%p2940_p7)
}
 0x392   :  { %2399 = dma.vmem_to_hbm [thread:$0]  %s2397_s7, 384, %s4533_s5, [#allocation3]  }
 0x393   :  { %2944 = dma.done.wait [#allocation3], 384  }
 0x394   :  { %2945 = vsyncadd [#allocation3], 4294966912 }
 0x395   :  { %2403 = vsyncpa [#allocation3], 1 }

</bundles_post_ra>
